<compile_context>
chip_gen: v5e
topology: v5e:2x2
jax: 0.10.0
libtpu: 0.0.40
codegen_flags: <defaults>
</compile_context>

<pallas_src>
import math
from collections import namedtuple
from functools import partial

import jax
import jax.numpy as jnp
from jax import lax
from jax.experimental import pallas as pl
from jax.experimental.pallas import tpu as pltpu

SegmenterOutput = namedtuple("SegmenterOutput", ["segments", "aux"])

_F_PAD = 8         # padded feature width: C color + 2 spatial + 1 ones (counts) col
_LANES = 128
_TILE_N_MAX = 2048
_N_ITER = 5        # TODO(synk): skimage slic default max_num_iter=10; 5 kept from prior port


def _round_up(x, m):
    return ((x + m - 1) // m) * m


def _pick_tile_n(k_pad):
    # Keep the [TN, K] f32 intermediates around ~4 MiB and keep TN a multiple of
    # 1024 so rows = TN/128 is 8-sublane aligned whenever the pixel axis is tiled.
    cap = ((1 << 20) // k_pad) // 1024 * 1024
    return int(min(_TILE_N_MAX, max(1024, cap)))


# ----------------------------- Pallas kernel -------------------------------
def _slic_kernel(centers_init_ref, feats_ref, labels_ref,
                 sums_ref, centers_ref, *, k_valid, ones_col):
    """One (batch, iteration, pixel-tile) grid step of SLIC k-means."""
    it = pl.program_id(1)
    nt = pl.program_id(2)
    n_tiles = pl.num_programs(2)
    last_it = pl.num_programs(1) - 1

    # Load the initial centers once per image.
    @pl.when((it == 0) & (nt == 0))
    def _():
        centers_ref[...] = centers_init_ref[0]

    # Reset the per-iteration accumulator at the first pixel tile.
    @pl.when(nt == 0)
    def _():
        sums_ref[...] = jnp.zeros_like(sums_ref)

    feats_bf = feats_ref[0]                                     # [TN, F] bf16
    centers = centers_ref[...]                                  # [F, K]  f32
    tn = feats_bf.shape[0]
    k_pad = centers.shape[1]

    # Distances up to a per-pixel constant: -2 p.c + ||c||^2  (||p||^2 dropped,
    # it does not change the argmin; -2 is folded into the bf16 center operand).
    c2 = jnp.sum(centers * centers, axis=0, keepdims=True)      # [1, K]
    neg2c_bf = (centers * jnp.float32(-2.0)).astype(jnp.bfloat16)
    dist = lax.dot_general(                                     # [TN, K]  (MXU)
        feats_bf, neg2c_bf, (((1,), (0,)), ((), ())),
        preferred_element_type=jnp.float32) + c2

    iota_k = lax.broadcasted_iota(jnp.int32, (tn, k_pad), 1)
    if k_valid < k_pad:                                          # mask padded clusters
        dist = jnp.where(iota_k < k_valid, dist, jnp.float32(1e30))

    # argmin over clusters (first-index tie-break, like jnp.argmin)
    min_d = jnp.min(dist, axis=-1, keepdims=True)                # [TN, 1]
    labels = jnp.min(jnp.where(dist <= min_d, iota_k, k_pad),
                     axis=-1).astype(jnp.int32)                  # [TN]

    # Lane-dense labels write, only needed on the final SLIC iteration.
    rows = tn // _LANES
    row0 = pl.multiple_of(nt * rows, rows)

    @pl.when(it == last_it)
    def _():
        labels_ref[0, pl.ds(row0, rows), :] = labels.reshape(rows, _LANES)

    # Per-cluster feature sums; counts ride along in the ones column of feats
    # (padded pixels have an all-zero feature row so they contribute nothing).
    onehot = (labels[:, None] == iota_k).astype(jnp.bfloat16)    # [TN, K]
    sums_ref[...] += lax.dot_general(                            # [F, K]  (MXU)
        feats_bf, onehot, (((0,), (0,)), ((), ())),
        preferred_element_type=jnp.float32)

    # After the last pixel tile: update centers in place for the next iteration.
    @pl.when(nt == n_tiles - 1)
    def _():
        sums = sums_ref[...]
        cnt = sums[ones_col:ones_col + 1, :]                     # [1, K] == counts
        centers_ref[...] = jnp.where(
            cnt > 0.5, sums / jnp.maximum(cnt, 1.0), centers_ref[...])


# ------------------------------ JAX glue ------------------------------------
def _init_center_indices(H, W, K):
    gr = max(1, int(round(math.sqrt(K))))
    gc = int(math.ceil(K / gr))
    idx = []
    for k in range(K):
        r = min(H - 1, int((k // gc + 0.5) * H / gr))
        c = min(W - 1, int((k % gc + 0.5) * W / gc))
        idx.append(r * W + c)
    return idx


@partial(jax.jit, static_argnames=("n_segments", "compactness", "n_iter", "start_label"))
def _slic_forward(x, *, n_segments, compactness, n_iter, start_label):
    """Simplified SLIC on a batch (B, C, H, W) -> segments (B, 1, H, W) int32."""
    B, C, H, W = x.shape
    N = H * W
    K = int(n_segments)
    assert C + 3 <= _F_PAD, f"at most {_F_PAD - 3} channels supported"
    K_pad = _round_up(K, _LANES)

    # pixel features: scaled color, scaled xy, ones column (for in-matmul counts)
    color = x.reshape(B, C, N).transpose(0, 2, 1).astype(jnp.float32)     # [B,N,C]
    yy, xx = jnp.meshgrid(jnp.arange(H, dtype=jnp.float32),
                          jnp.arange(W, dtype=jnp.float32), indexing="ij")
    spatial = jnp.stack([yy.reshape(-1), xx.reshape(-1)], axis=-1)        # [N,2]
    step = math.sqrt(N / K)
    ones_col = C + 2
    feats = jnp.concatenate([
        color / float(compactness),
        jnp.broadcast_to(spatial / step, (B, N, 2)),
        jnp.ones((B, N, 1), jnp.float32),
    ], axis=-1)                                                           # [B,N,C+3]
    feats = jnp.pad(feats, ((0, 0), (0, 0), (0, _F_PAD - (C + 3))))       # [B,N,8]

    # initial centers on a regular spatial grid; padded clusters are all-zero
    # (distance-masked inside the kernel).  Stored transposed (K along lanes).
    idx = jnp.asarray(_init_center_indices(H, W, K), dtype=jnp.int32)
    centers0 = jnp.take(feats, idx, axis=1)                               # [B,K,8]
    centers0 = jnp.pad(centers0, ((0, 0), (0, K_pad - K), (0, 0)))        # [B,Kp,8]
    centers0 = jnp.transpose(centers0, (0, 2, 1))                         # [B,8,Kp]

    # pad / tile the pixel axis; padded pixels have all-zero feature rows
    # (including the ones column) so they never contribute to sums/counts.
    TILE_N = _pick_tile_n(K_pad)
    if N <= TILE_N:
        N_pad = _round_up(N, _LANES)
        TN = N_pad
    else:
        N_pad = _round_up(N, TILE_N)
        TN = TILE_N
    feats = jnp.pad(feats, ((0, 0), (0, N_pad - N), (0, 0)))
    feats_bf = feats.astype(jnp.bfloat16)
    NT = N_pad // TN
    rows_total = N_pad // _LANES

    kernel = partial(_slic_kernel, k_valid=K, ones_col=ones_col)
    labels3d = pl.pallas_call(
        kernel,
        grid_spec=pltpu.PrefetchScalarGridSpec(
            num_scalar_prefetch=0,
            grid=(B, n_iter, NT),
            in_specs=[
                pl.BlockSpec((1, _F_PAD, K_pad), lambda b, it, nt: (b, 0, 0)),
                pl.BlockSpec((1, TN, _F_PAD), lambda b, it, nt: (b, nt, 0)),
            ],
            out_specs=pl.BlockSpec((1, rows_total, _LANES),
                                   lambda b, it, nt: (b, 0, 0)),
            scratch_shapes=[
                pltpu.VMEM((_F_PAD, K_pad), jnp.float32),   # per-cluster sums (+counts)
                pltpu.VMEM((_F_PAD, K_pad), jnp.float32),   # resident cluster centers
            ],
        ),
        out_shape=jax.ShapeDtypeStruct((B, rows_total, _LANES), jnp.int32),
        compiler_params=pltpu.CompilerParams(
            dimension_semantics=("parallel", "arbitrary", "arbitrary"),
            vmem_limit_bytes=32 * 1024 * 1024,
        ),
    )(centers0, feats_bf)

    labels = labels3d.reshape(B, N_pad)[:, :N].reshape(B, H, W)
    return (labels + jnp.int32(start_label))[:, None]                     # (B,1,H,W)


class Superpixels:
    """JAX/Pallas port of exlib Superpixels (only 'slic' has a kernel path)."""

    def __init__(self, method, **kwargs):
        self.method = method
        self.kwargs = kwargs
        self.set_defaults()

    def set_defaults(self):
        if self.method == "felzenszwalb":
            self.kwargs.setdefault("scale", 100)
            self.kwargs.setdefault("sigma", 0.5)
            self.kwargs.setdefault("min_size", 50)
        elif self.method == "slic":
            self.kwargs.setdefault("n_segments", 250)
            self.kwargs.setdefault("compactness", 10)
            self.kwargs.setdefault("sigma", 1)
            self.kwargs.setdefault("start_label", 1)
        elif self.method == "quickshift":
            self.kwargs.setdefault("kernel_size", 3)
            self.kwargs.setdefault("max_dist", 6)
            self.kwargs.setdefault("ratio", 0.5)
        elif self.method == "watershed":
            self.kwargs.setdefault("markers", 250)
            self.kwargs.setdefault("compactness", 0.001)
        else:
            raise ValueError(f"Unknown method: {self.method}")

    def __call__(self, x):
        # x: (B, C, H, W)
        if self.method != "slic":
            # TODO(synk): felzenszwalb/quickshift/watershed are irregular graph /
            # flood-fill algorithms with no clean Pallas equivalent.
            raise NotImplementedError(
                f"Pallas path only supports 'slic', got {self.method}")
        segments = _slic_forward(
            x,
            n_segments=int(self.kwargs["n_segments"]),
            compactness=float(self.kwargs["compactness"]),
            n_iter=_N_ITER,
            start_label=int(self.kwargs["start_label"]),
        )
        return SegmenterOutput(segments, {})


if __name__ == "__main__":
    key = jax.random.PRNGKey(0)
    # small RGB batch: B=2, C=3, H=W=16
    x = jax.random.uniform(key, (2, 3, 16, 16), dtype=jnp.float32)

    seg = Superpixels("slic", n_segments=16, compactness=1.0, start_label=1)
    out = seg(x)
    segments = jax.block_until_ready(out.segments)

    assert segments.shape == (2, 1, 16, 16)
    assert segments.dtype == jnp.int32
    assert int(segments.min()) >= 1 and int(segments.max()) <= 16
    print("KERNEL_OK")
</pallas_src>

<mosaic_0001>
module attributes {stable_mosaic.version = 11 : i64} {
  func.func @_slic_kernel(%arg0: i32, %arg1: i32, %arg2: i32, %arg3: memref<1x8x128xf32, #tpu.memory_space<vmem>>, %arg4: memref<1x256x8xbf16, #tpu.memory_space<vmem>>, %arg5: memref<1x2x128xi32, #tpu.memory_space<vmem>>, %arg6: memref<8x128xf32, #tpu.memory_space<vmem>>, %arg7: memref<8x128xf32, #tpu.memory_space<vmem>>) attributes {dimension_semantics = [#tpu.dimension_semantics<parallel>, #tpu.dimension_semantics<arbitrary>, #tpu.dimension_semantics<arbitrary>], iteration_bounds = array<i64: 2, 5, 1>, scalar_prefetch = 0 : i64, scratch_operands = 2 : i64, tpu.core_type = #tpu.core_type<tc>, window_params = [{transform_indices = @transform_0, window_bounds = array<i64: 1, 8, 128>}, {transform_indices = @transform_1, window_bounds = array<i64: 1, 256, 8>}, {transform_indices = @transform_2, window_bounds = array<i64: 1, 2, 128>}]} {
    %c0_i32 = arith.constant 0 : i32
    %0 = arith.cmpi eq, %arg1, %c0_i32 : i32
    %c0_i32_0 = arith.constant 0 : i32
    %1 = arith.cmpi eq, %arg2, %c0_i32_0 : i32
    %2 = arith.andi %0, %1 : i1
    %3 = arith.extui %2 : i1 to i32
    %c0_i32_1 = arith.constant 0 : i32
    %4 = arith.cmpi ne, %3, %c0_i32_1 : i32
    scf.if %4 {
      %c0_21 = arith.constant 0 : index
      %c0_22 = arith.constant 0 : index
      %c0_23 = arith.constant 0 : index
      %50 = vector.load %arg3[%c0_21, %c0_22, %c0_23] : memref<1x8x128xf32, #tpu.memory_space<vmem>>, vector<1x8x128xf32>
      %51 = vector.shape_cast %50 : vector<1x8x128xf32> to vector<8x128xf32>
      %c0_24 = arith.constant 0 : index
      %c0_25 = arith.constant 0 : index
      %52 = vector.load %arg7[%c0_24, %c0_25] : memref<8x128xf32, #tpu.memory_space<vmem>>, vector<8x128xf32>
      tpu.vector_store %arg7[%c0_24, %c0_25], %51 {strides = array<i32>} : memref<8x128xf32, #tpu.memory_space<vmem>>, vector<8x128xf32>,
    } else {
    }
    %c0_i32_2 = arith.constant 0 : i32
    %5 = arith.cmpi eq, %arg2, %c0_i32_2 : i32
    %6 = arith.extui %5 : i1 to i32
    %c0_i32_3 = arith.constant 0 : i32
    %7 = arith.cmpi ne, %6, %c0_i32_3 : i32
    scf.if %7 {
      %cst_21 = arith.constant 0.000000e+00 : f32
      %50 = vector.broadcast %cst_21 : f32 to vector<8x128xf32>
      %c0_22 = arith.constant 0 : index
      %c0_23 = arith.constant 0 : index
      %51 = vector.load %arg6[%c0_22, %c0_23] : memref<8x128xf32, #tpu.memory_space<vmem>>, vector<8x128xf32>
      tpu.vector_store %arg6[%c0_22, %c0_23], %50 {strides = array<i32>} : memref<8x128xf32, #tpu.memory_space<vmem>>, vector<8x128xf32>,
    } else {
    }
    %c0 = arith.constant 0 : index
    %c0_4 = arith.constant 0 : index
    %c0_5 = arith.constant 0 : index
    %8 = vector.load %arg4[%c0, %c0_4, %c0_5] : memref<1x256x8xbf16, #tpu.memory_space<vmem>>, vector<1x256x8xbf16>
    %9 = vector.shape_cast %8 : vector<1x256x8xbf16> to vector<256x8xbf16>
    %c0_6 = arith.constant 0 : index
    %c0_7 = arith.constant 0 : index
    %10 = vector.load %arg7[%c0_6, %c0_7] : memref<8x128xf32, #tpu.memory_space<vmem>>, vector<8x128xf32>
    %11 = arith.mulf %10, %10 : vector<8x128xf32>
    %cst = arith.constant dense<0.000000e+00> : vector<128xf32>
    %12 = vector.multi_reduction <add>, %11, %cst [0] : vector<8x128xf32> to vector<128xf32>
    %13 = vector.shape_cast %12 : vector<128xf32> to vector<1x128xf32>
    %cst_8 = arith.constant -2.000000e+00 : f32
    %14 = vector.broadcast %cst_8 : f32 to vector<8x128xf32>
    %15 = arith.mulf %10, %14 : vector<8x128xf32>
    %16 = arith.truncf %15 : vector<8x128xf32> to vector<8x128xbf16>
    %cst_9 = arith.constant dense<0.000000e+00> : vector<256x128xf32>
    %17 = tpu.matmul %9, %16, %cst_9 {dimension_numbers = #tpu.dot_dimension_numbers<[1], [0], [0], [1], [0, 0, 1, 1], [], []>} : vector<256x8xbf16>, vector<8x128xbf16>, vector<256x128xf32> -> vector<256x128xf32>
    %18 = vector.broadcast %13 : vector<1x128xf32> to vector<256x128xf32>
    %19 = arith.addf %17, %18 : vector<256x128xf32>
    %20 = tpu.iota {dimensions = array<i32: 1>} : vector<256x128xi32>
    %c16_i32 = arith.constant 16 : i32
    %21 = vector.broadcast %c16_i32 : i32 to vector<256x128xi32>
    %22 = arith.cmpi slt, %20, %21 : vector<256x128xi32>
    %cst_10 = arith.constant 1.000000e+30 : f32
    %23 = vector.broadcast %cst_10 : f32 to vector<256x128xf32>
    %24 = arith.select %22, %19, %23 : vector<256x128xi1>, vector<256x128xf32>
    %cst_11 = arith.constant dense<0x7F800000> : vector<256xf32>
    %25 = vector.multi_reduction <minimumf>, %24, %cst_11 [1] : vector<256x128xf32> to vector<256xf32>
    %26 = vector.shape_cast %25 : vector<256xf32> to vector<256x1xf32>
    %27 = vector.broadcast %26 : vector<256x1xf32> to vector<256x128xf32>
    %28 = arith.cmpf ole, %24, %27 : vector<256x128xf32>
    %c128_i32 = arith.constant 128 : i32
    %29 = vector.broadcast %c128_i32 : i32 to vector<256x128xi32>
    %30 = arith.select %28, %20, %29 : vector<256x128xi1>, vector<256x128xi32>
    %cst_12 = arith.constant dense<2147483647> : vector<256xi32>
    %31 = vector.multi_reduction <minsi>, %30, %cst_12 [1] : vector<256x128xi32> to vector<256xi32>
    %c2_i32 = arith.constant 2 : i32
    %32 = arith.muli %arg2, %c2_i32 : i32
    %33 = tpu.assume_multiple %32, 2 : i32
    %c4_i32 = arith.constant 4 : i32
    %34 = arith.cmpi eq, %arg1, %c4_i32 : i32
    %35 = arith.extui %34 : i1 to i32
    %c0_i32_13 = arith.constant 0 : i32
    %36 = arith.cmpi ne, %35, %c0_i32_13 : i32
    scf.if %36 {
      %50 = vector.shape_cast %31 : vector<256xi32> to vector<2x128xi32>
      %c0_21 = arith.constant 0 : index
      %51 = arith.index_cast %33 : i32 to index
      %c0_22 = arith.constant 0 : index
      %52 = vector.load %arg5[%c0_21, %51, %c0_22] : memref<1x2x128xi32, #tpu.memory_space<vmem>>, vector<1x2x128xi32>
      %53 = vector.shape_cast %52 : vector<1x2x128xi32> to vector<2x128xi32>
      %54 = vector.shape_cast %50 : vector<2x128xi32> to vector<1x2x128xi32>
      tpu.vector_store %arg5[%c0_21, %51, %c0_22], %54 {strides = array<i32>} : memref<1x2x128xi32, #tpu.memory_space<vmem>>, vector<1x2x128xi32>,
    } else {
    }
    %37 = vector.shape_cast %31 : vector<256xi32> to vector<256x1xi32>
    %38 = vector.broadcast %37 : vector<256x1xi32> to vector<256x128xi32>
    %39 = arith.cmpi eq, %38, %20 : vector<256x128xi32>
    %40 = arith.extui %39 : vector<256x128xi1> to vector<256x128xi32>
    %41 = arith.sitofp %40 : vector<256x128xi32> to vector<256x128xf32>
    %42 = arith.truncf %41 : vector<256x128xf32> to vector<256x128xbf16>
    %c0_14 = arith.constant 0 : index
    %c0_15 = arith.constant 0 : index
    %43 = vector.load %arg6[%c0_14, %c0_15] : memref<8x128xf32, #tpu.memory_space<vmem>>, vector<8x128xf32>
    %cst_16 = arith.constant dense<0.000000e+00> : vector<8x128xf32>
    %44 = tpu.matmul %9, %42, %cst_16 {dimension_numbers = #tpu.dot_dimension_numbers<[0], [0], [1], [1], [0, 1, 1, 1], [], []>} : vector<256x8xbf16>, vector<256x128xbf16>, vector<8x128xf32> -> vector<8x128xf32>
    %45 = arith.addf %43, %44 : vector<8x128xf32>
    %c0_17 = arith.constant 0 : index
    %c0_18 = arith.constant 0 : index
    %46 = vector.load %arg6[%c0_17, %c0_18] : memref<8x128xf32, #tpu.memory_space<vmem>>, vector<8x128xf32>
    tpu.vector_store %arg6[%c0_17, %c0_18], %45 {strides = array<i32>} : memref<8x128xf32, #tpu.memory_space<vmem>>, vector<8x128xf32>,
    %c0_i32_19 = arith.constant 0 : i32
    %47 = arith.cmpi eq, %arg2, %c0_i32_19 : i32
    %48 = arith.extui %47 : i1 to i32
    %c0_i32_20 = arith.constant 0 : i32
    %49 = arith.cmpi ne, %48, %c0_i32_20 : i32
    scf.if %49 {
      %c0_21 = arith.constant 0 : index
      %c0_22 = arith.constant 0 : index
      %50 = vector.load %arg6[%c0_21, %c0_22] : memref<8x128xf32, #tpu.memory_space<vmem>>, vector<8x128xf32>
      %51 = vector.extract_strided_slice %50 {offsets = [5, 0], sizes = [1, 128], strides = [1, 1]} : vector<8x128xf32> to vector<1x128xf32>
      %cst_23 = arith.constant 5.000000e-01 : f32
      %52 = vector.broadcast %cst_23 : f32 to vector<1x128xf32>
      %53 = arith.cmpf ogt, %51, %52 : vector<1x128xf32>
      %cst_24 = arith.constant 1.000000e+00 : f32
      %54 = vector.broadcast %cst_24 : f32 to vector<1x128xf32>
      %55 = arith.maximumf %51, %54 : vector<1x128xf32>
      %56 = vector.broadcast %55 : vector<1x128xf32> to vector<8x128xf32>
      %57 = arith.divf %50, %56 : vector<8x128xf32>
      %c0_25 = arith.constant 0 : index
      %c0_26 = arith.constant 0 : index
      %58 = vector.load %arg7[%c0_25, %c0_26] : memref<8x128xf32, #tpu.memory_space<vmem>>, vector<8x128xf32>
      %59 = vector.shape_cast %53 : vector<1x128xi1> to vector<1x128xi1>
      %60 = vector.broadcast %59 : vector<1x128xi1> to vector<8x128xi1>
      %61 = arith.select %60, %57, %58 : vector<8x128xi1>, vector<8x128xf32>
      %c0_27 = arith.constant 0 : index
      %c0_28 = arith.constant 0 : index
      %62 = vector.load %arg7[%c0_27, %c0_28] : memref<8x128xf32, #tpu.memory_space<vmem>>, vector<8x128xf32>
      tpu.vector_store %arg7[%c0_27, %c0_28], %61 {strides = array<i32>} : memref<8x128xf32, #tpu.memory_space<vmem>>, vector<8x128xf32>,
    } else {
    }
    return
  }
  func.func @transform_0(%arg0: i32, %arg1: i32, %arg2: i32) -> (i32, i32, i32) {
    %c0_i32 = arith.constant 0 : i32
    %c0_i32_0 = arith.constant 0 : i32
    %c0_i32_1 = arith.constant 0 : i32
    return %arg0, %c0_i32, %c0_i32_0 : i32, i32, i32
  }
  func.func @transform_1(%arg0: i32, %arg1: i32, %arg2: i32) -> (i32, i32, i32) {
    %c0_i32 = arith.constant 0 : i32
    %c0_i32_0 = arith.constant 0 : i32
    return %arg0, %arg2, %c0_i32 : i32, i32, i32
  }
  func.func @transform_2(%arg0: i32, %arg1: i32, %arg2: i32) -> (i32, i32, i32) {
    %c0_i32 = arith.constant 0 : i32
    %c0_i32_0 = arith.constant 0 : i32
    %c0_i32_1 = arith.constant 0 : i32
    return %arg0, %c0_i32, %c0_i32_0 : i32, i32, i32
  }
}

</mosaic_0001>

<bundles_post_ra>
// kernel: _slic_forward.1
= control target key start
LH: loop header
LB: loop body
LE: loop exit
PB: predicated region body
PF: predicated region fallthrough
CT: control target
= control target key end

     0   :  { %s1782_s9 = smov 0   ;;  %s1784_s10 = smov 0   ;;  %s2822_s0 = inlined_call_operand.vmem [shape: f32[2,8,128], index: 0, kind: input, shape index: {}]   ;;  %s2823_s1 = inlined_call_operand.vmem [shape: bf16[2,256,8], index: 1, kind: input, shape index: {}]   ;;  %s2824_s2 = inlined_call_operand.vmem [shape: s32[2,2,128], index: 2, kind: output, shape index: {}]  }
   0x1   :  { %s1786_s11 = smov 0   ;;  %s1788_s12 = smov 0  }
   0x2   :  { %s1790_s13 = smov 0  }
   0x3 LB: > { %s27_s14 = sadd.s32 1, %s1753_s11  ;;  %s31_s15 = sadd.s32 1, %s1757_s12  ;;  %s1761_s13 = sphi %s1790_s13, %s12_s13   ;;  %s1757_s12 = sphi %s1788_s12, %s2912_s12   ;;  %s1753_s11 = sphi %s1786_s11, %s2911_s11   ;;  %s1749_s10 = sphi %s1784_s10, %s2910_s10   ;;  %s1745_s9 = sphi %s1782_s9, %s2909_s9  }
   0x4   : > { %p29_p0 = scmp.ge.s32.totalorder %s27_s14, 5  ;;  %p1487_p1 = scmp.ge.s32.totalorder %s1761_s13, 1 }
   0x5   : > { %p147_p2 = scmp.lt.s32.totalorder %s1761_s13, 11 }
   0x6   : > { %s2914_s14 = smov (%p29_p0, %s27_s14), 0  ;;  %s2916_s15 = smov (!%p29_p0, %s31_s15), %s1757_s12 }
   0x7   : > { %p148_p3 = pnand %p1487_p1, %p147_p2  ;;  %p33_p4 = scmp.ge.s32.totalorder %s2916_s15, 2 }
   0x9   : > { %s2918_s15 = smov (%p33_p4, %s2916_s15), 0  ;;  %151 = sbr.rel (%p148_p3) target bundleno = 995 (0x3e3), region = 28 }
   0xe   : > { %p176_p5 = scmp.lt.s32.totalorder %s1749_s10, 1  ;;  %p195_p6 = scmp.eq.s32.totalorder %s1745_s9, 0 }
  0x10   : > { %s2920_s10 = smov (!%p176_p5, %s1749_s10), 1  ;;  %200 = sbr.rel (!%p195_p6) target bundleno = 21 (0x15), region = 32 }
  0x11   : > { %s1488_s16 = sshll.u32 %s2920_s10, 3  ;;  %s1641_s17 = sshll.u32 %s2920_s10, 7 }
  0x12   : > { %s179_s20 = scalar_lea.vmem %s2822_s0, %s1488_s16  ;;  %s1821_s23 = scalar_lea.vmem %s2823_s1, %s1641_s17 }
  0x13   : > { %s1491_s24 = sshll.u32 %s2920_s10, 1  ;;  %v201_v0 = vld [vmem:[%s179_s20] sm:$0xff] (%p195_p6) }
  0x14   : > { %s1826_s27 = scalar_lea.vmem %s2824_s2, %s1491_s24  ;;  %202 = vst [vmem:[#allocation3] sm:$0xff] (%p195_p6), %v201_v0 }
  0x15 PF: > { %v1763_v2 = vmov 0.0   ;;  %vm378_vm0 = vcmask 1043456   ;;  %v1829_v6 = vld [vmem:[%s1821_s23] sm:$0xff]  ;;  %v1832_v7 = vld [vmem:[%s1821_s23 + $0x30] sm:$0xff]  ;;  %vm329_vm1 = vcmask 64512   ;;  %v1835_v8 = vld [vmem:[%s1821_s23 + $0x58] sm:$0xff]  ;;  %v471_v27 = vlaneseq }
  0x16   : > { %206 = vst [vmem:[#allocation2] sm:$0xff] %v1763_v2  ;;  %v1844_v9 = vld [vmem:[%s1821_s23 + $0x8] sm:$0xff]  ;;  %v1847_v10 = vld [vmem:[%s1821_s23 + $0x38] sm:$0xff]  ;;  %v1850_v11 = vld [vmem:[%s1821_s23 + $0x60] sm:$0xff]  ;;  %p1573_p7 = scmp.ne.s32.totalorder %s1745_s9, 4 }
  0x17   : > { %2854 = vst [vmem:[#allocation4_spill] sm:$0xff] %v1829_v6  ;;  %v1859_v12 = vld [vmem:[%s1821_s23 + $0x10] sm:$0xff]  ;;  %v1862_v13 = vld [vmem:[%s1821_s23 + $0x40] sm:$0xff]  ;;  %v1865_v14 = vld [vmem:[%s1821_s23 + $0x68] sm:$0xff]  ;;  %v1908_v29 = vand.u32 127, %v471_v27 }
  0x18   : > { %2855 = vst [vmem:[#allocation5_spill] sm:$0xff] %v1832_v7  ;;  %v1874_v15 = vld [vmem:[%s1821_s23 + $0x18] sm:$0xff]  ;;  %v1877_v16 = vld [vmem:[%s1821_s23 + $0x48] sm:$0xff]  ;;  %v1880_v17 = vld [vmem:[%s1821_s23 + $0x70] sm:$0xff] }
  0x19   : > { %2856 = vst [vmem:[#allocation6_spill] sm:$0xff] %v1835_v8  ;;  %v1889_v18 = vld [vmem:[%s1821_s23 + $0x20] sm:$0xff]  ;;  %v1892_v19 = vld [vmem:[%s1821_s23 + $0x50] sm:$0xff]  ;;  %v1895_v20 = vld [vmem:[%s1821_s23 + $0x78] sm:$0xff]  ;;  %vm473_vm2 = vcmp.lt.s32.totalorder %v1908_v29, 16 }
  0x1a   : > { %2857 = vst [vmem:[#allocation7_spill] sm:$0xff] %v1844_v9  ;;  %v1904_v21 = vld [vmem:[%s1821_s23 + $0x28] sm:$0xff] }
  0x1b   : > { %v239_v1 = vld [vmem:[#allocation3] sm:$0xff]  ;;  %2858 = vst [vmem:[#allocation8_spill] sm:$0xff] %v1847_v10 }
  0x1c   : > { %v247_v3 = vmul.f32 -2.0, %v239_v1  ;;  %2859 = vst [vmem:[#allocation9_spill] sm:$0xff] %v1850_v11  ;;  %v240_v22 = vmul.f32 %v239_v1, %v239_v1 }
  0x1d   : > { %2860 = vst [vmem:[#allocation10_spill] sm:$0xff] %v1859_v12 }
  0x1e   : > { %v248_v4 = vpack.c.bf16 %v247_v3, %v247_v3  ;;  %2861 = vst [vmem:[#allocation11_spill] sm:$0xff] %v1862_v13  ;;  %v241_v23 = vrot.slane %v240_v22, 4 }
  0x1f   : > { %2862 = vst [vmem:[#allocation12_spill] sm:$0xff] %v1865_v14 }
  0x20   : > { %v380_v5 = vsel %vm378_vm0, %v248_v4, 0  ;;  %2863 = vst [vmem:[#allocation13_spill] sm:$0xff] %v1874_v15  ;;  %v242_v24 = vadd.f32 %v241_v23, %v240_v22 }
  0x21   : > { %389 = vmatpush.bf16.msra.mxu0 %v380_v5  ;;  %1659 = vmatpush.bf16.msra.mxu1 %v380_v5  ;;  %2864 = vst [vmem:[#allocation14_spill] sm:$0xff] %v1877_v16 }
  0x22   : > { %1660 = vmatpush.bf16.msra.mxu3 %v380_v5  ;;  %2865 = vst [vmem:[#allocation15_spill] sm:$0xff] %v1880_v17  ;;  %v243_v25 = vrot.slane %v242_v24, 2 }
  0x23   : > { %2866 = vst [vmem:[#allocation16_spill] sm:$0xff] %v1889_v18 }
  0x24   : > { %1557 = vmatmul.msk.bf16.vlgmr.msra.gmra.mxu0 %vm329_vm1, %v1829_v6  ;;  %1563 = vmatmul.msk.bf16.vlgmr.msra.gmra.mxu1 %vm329_vm1, %v1832_v7  ;;  %2867 = vst [vmem:[#allocation17_spill] sm:$0xff] %v1892_v19  ;;  %v244_v26 = vadd.f32 %v243_v25, %v242_v24 }
  0x25   : > { %1568 = vmatmul.msk.bf16.vlgmr.msra.gmra.mxu3 %vm329_vm1, %v1835_v8  ;;  %2868 = vst [vmem:[#allocation18_spill] sm:$0xff] %v1895_v20 }
  0x26   : > { %2869 = vst [vmem:[#allocation19_spill] sm:$0xff] %v1904_v21  ;;  %v245_v28 = vrot.slane %v244_v26, 1 }
  0x27   : > { %2870 = vst [vmem:[#allocation20_spill] sm:$0xff] %v1908_v29 }
  0x28   : > { %v1910_v30 = vadd.f32 %v245_v28, %v244_v26 }
  0x34   : > { %1558 = vmatmul.msk.bf16.gmra.mxu0 %vm329_vm1, %v1844_v9  ;;  %1564 = vmatmul.msk.bf16.gmra.mxu1 %vm329_vm1, %v1847_v10 }
  0x35   : > { %1569 = vmatmul.msk.bf16.gmra.mxu3 %vm329_vm1, %v1850_v11 }
  0x44   : > { %1559 = vmatmul.msk.bf16.gmra.mxu0 %vm329_vm1, %v1859_v12  ;;  %1565 = vmatmul.msk.bf16.gmra.mxu1 %vm329_vm1, %v1862_v13 }
  0x45   : > { %1570 = vmatmul.msk.bf16.gmra.mxu3 %vm329_vm1, %v1865_v14 }
  0x54   : > { %1560 = vmatmul.msk.bf16.gmra.mxu0 %vm329_vm1, %v1874_v15  ;;  %1566 = vmatmul.msk.bf16.gmra.mxu1 %vm329_vm1, %v1877_v16 }
  0x55   : > { %1571 = vmatmul.msk.bf16.gmra.mxu3 %vm329_vm1, %v1880_v17 }
  0x64   : > { %1561 = vmatmul.msk.bf16.gmra.mxu0 %vm329_vm1, %v1889_v18  ;;  %1567 = vmatmul.msk.bf16.gmra.mxu1 %vm329_vm1, %v1892_v19 }
  0x65   : > { %1572 = vmatmul.msk.bf16.gmra.mxu3 %vm329_vm1, %v1895_v20 }
  0x74   : > { %1562 = vmatmul.msk.bf16.gmra.mxu0 %vm329_vm1, %v1904_v21 }
  0xa1   : > { %v391_v31 = vpop.f32.mrf.mxu0  ;;  %v421_v32 = vpop.f32.mrf.mxu1 }
  0xa2   : > { %v392_v33 = vadd.f32 %v391_v31, %v1910_v30  ;;  %v422_v35 = vadd.f32 %v421_v32, %v1910_v30 }
  0xa4   : > { %v1916_v34 = vsel %vm473_vm2, %v392_v33, 1e+30  ;;  %v1923_v40 = vsel %vm473_vm2, %v422_v35, 1e+30 }
  0xa5   : > { %506 = vmin.xlane.f32.xlu0 %v1916_v34 }
  0xa8   : > { %v446_v36 = vpop.f32.mrf.mxu3 }
  0xa9   : > { %v447_v37 = vadd.f32 %v446_v36, %v1910_v30  ;;  %v393_v38 = vpop.f32.mrf.mxu0  ;;  %v423_v39 = vpop.f32.mrf.mxu1 }
  0xaa   : > { %v424_v42 = vadd.f32 %v423_v39, %v1910_v30  ;;  %v394_v43 = vadd.f32 %v393_v38, %v1910_v30 }
  0xab   : > { %v1927_v41 = vsel %vm473_vm2, %v447_v37, 1e+30 }
  0xac   : > { %550 = vmin.xlane.f32.xlu1 %v1927_v41  ;;  %v1940_v49 = vsel %vm473_vm2, %v424_v42, 1e+30  ;;  %v1946_v50 = vsel %vm473_vm2, %v394_v43, 1e+30 }
  0xad   : > { %530 = vmin.xlane.f32.xlu0 %v1923_v40 }
  0xb0   : > { %v448_v44 = vpop.f32.mrf.mxu3 }
  0xb1   : > { %v449_v45 = vadd.f32 %v448_v44, %v1910_v30  ;;  %v396_v46 = vpop.f32.mrf.mxu0  ;;  %v426_v47 = vpop.f32.mrf.mxu1 }
  0xb2   : > { %v427_v51 = vadd.f32 %v426_v47, %v1910_v30  ;;  %v397_v52 = vadd.f32 %v396_v46, %v1910_v30 }
  0xb3   : > { %v1936_v48 = vsel %vm473_vm2, %v449_v45, 1e+30 }
  0xb4   : > { %552 = vmin.xlane.f32.xlu2 %v1936_v48  ;;  %532 = vmin.xlane.f32.xlu1 %v1940_v49  ;;  %v1954_v56 = vsel %vm473_vm2, %v427_v51, 1e+30  ;;  %v1958_v58 = vsel %vm473_vm2, %v397_v52, 1e+30 }
  0xb5   : > { %508 = vmin.xlane.f32.xlu0 %v1946_v50 }
  0xb8   : > { %v451_v53 = vpop.f32.mrf.mxu3 }
  0xb9   : > { %v452_v54 = vadd.f32 %v451_v53, %v1910_v30  ;;  %v398_v55 = vpop.f32.mrf.mxu0  ;;  %v428_v57 = vpop.f32.mrf.mxu1 }
  0xba   : > { %v399_v60 = vadd.f32 %v398_v55, %v1910_v30  ;;  %v429_v61 = vadd.f32 %v428_v57, %v1910_v30 }
  0xbb   : > { %v1962_v59 = vsel %vm473_vm2, %v452_v54, 1e+30 }
  0xbc   : > { %534 = vmin.xlane.f32.xlu2 %v1954_v56  ;;  %510 = vmin.xlane.f32.xlu1 %v1958_v58  ;;  %v1972_v2 = vsel %vm473_vm2, %v399_v60, 1e+30  ;;  %v1981_v4 = vsel %vm473_vm2, %v429_v61, 1e+30 }
  0xbd   : > { %554 = vmin.xlane.f32.xlu0 %v1962_v59 }
  0xc0   : > { %v453_v62 = vpop.f32.mrf.mxu3 }
  0xc1   : > { %v401_v63 = vpop.f32.mrf.mxu0  ;;  %v431_v1 = vpop.f32.mrf.mxu1  ;;  %v454_v5 = vadd.f32 %v453_v62, %v1910_v30 }
  0xc2   : > { %v402_v0 = vadd.f32 %v401_v63, %v1910_v30  ;;  %v432_v28 = vadd.f32 %v431_v1, %v1910_v30 }
  0xc3   : > { %v1989_v25 = vsel %vm473_vm2, %v454_v5, 1e+30 }
  0xc4   : > { %512 = vmin.xlane.f32.xlu1 %v1972_v2  ;;  %v1977_v3 = vsel %vm473_vm2, %v402_v0, 1e+30  ;;  %v2002_v36 = vsel %vm473_vm2, %v432_v28, 1e+30 }
  0xc5   : > { %514 = vmin.xlane.f32.xlu2 %v1977_v3  ;;  %536 = vmin.xlane.f32.xlu0 %v1981_v4 }
  0xc8   : > { %v456_v22 = vpop.f32.mrf.mxu3 }
  0xc9   : > { %v457_v23 = vadd.f32 %v456_v22, %v1910_v30  ;;  %v403_v24 = vpop.f32.mrf.mxu0  ;;  %v433_v27 = vpop.f32.mrf.mxu1 }
  0xca   : > { %v404_v31 = vadd.f32 %v403_v24, %v1910_v30  ;;  %v434_v43 = vadd.f32 %v433_v27, %v1910_v30 }
  0xcb   : > { %v1993_v26 = vsel %vm473_vm2, %v457_v23, 1e+30 }
  0xcc   : > { %556 = vmin.xlane.f32.xlu1 %v1989_v25  ;;  %v2012_v38 = vsel %vm473_vm2, %v404_v31, 1e+30  ;;  %v2030_v52 = vsel %vm473_vm2, %v434_v43, 1e+30 }
  0xcd   : > { %558 = vmin.xlane.f32.xlu2 %v1993_v26 }
  0xd0   : > { %v458_v32 = vpop.f32.mrf.mxu3 }
  0xd1   : > { %v459_v33 = vadd.f32 %v458_v32, %v1910_v30  ;;  %v406_v35 = vpop.f32.mrf.mxu0  ;;  %v436_v42 = vpop.f32.mrf.mxu1 }
  0xd2   : > { %v407_v39 = vadd.f32 %v406_v35, %v1910_v30  ;;  %v437_v53 = vadd.f32 %v436_v42, %v1910_v30 }
  0xd3   : > { %v2006_v37 = vsel %vm473_vm2, %v459_v33, 1e+30 }
  0xd4   : > { %538 = vmin.xlane.f32.xlu1 %v2002_v36  ;;  %560 = vmin.xlane.f32.xlu0 %v2006_v37  ;;  %v2020_v47 = vsel %vm473_vm2, %v407_v39, 1e+30  ;;  %v2038_v62 = vsel %vm473_vm2, %v437_v53, 1e+30 }
  0xd5   : > { %516 = vmin.xlane.f32.xlu2 %v2012_v38 }
  0xd8   : > { %v461_v44 = vpop.f32.mrf.mxu3 }
  0xd9   : > { %v462_v45 = vadd.f32 %v461_v44, %v1910_v30  ;;  %v408_v46 = vpop.f32.mrf.mxu0  ;;  %v438_v57 = vpop.f32.mrf.mxu1 }
  0xda   : > { %v409_v54 = vadd.f32 %v408_v46, %v1910_v30  ;;  %v439_v5 = vadd.f32 %v438_v57, %v1910_v30 }
  0xdb   : > { %v2024_v51 = vsel %vm473_vm2, %v462_v45, 1e+30 }
  0xdc   : > { %562 = vmin.xlane.f32.xlu1 %v2024_v51  ;;  %518 = vmin.xlane.f32.xlu0 %v2020_v47  ;;  %v2042_v63 = vsel %vm473_vm2, %v409_v54, 1e+30  ;;  %v2060_v31 = vsel %vm473_vm2, %v439_v5, 1e+30 }
  0xdd   : > { %540 = vmin.xlane.f32.xlu2 %v2030_v52 }
  0xe0   : > { %v463_v55 = vpop.f32.mrf.mxu3 }
  0xe1   : > { %v464_v60 = vadd.f32 %v463_v55, %v1910_v30  ;;  %v411_v61 = vpop.f32.mrf.mxu0  ;;  %v441_v27 = vpop.f32.mrf.mxu1 }
  0xe2   : > { %v412_v1 = vadd.f32 %v411_v61, %v1910_v30  ;;  %v442_v33 = vadd.f32 %v441_v27, %v1910_v30 }
  0xe3   : > { %v2048_v0 = vsel %vm473_vm2, %v464_v60, 1e+30 }
  0xe4   : > { %520 = vmin.xlane.f32.xlu1 %v2042_v63  ;;  %542 = vmin.xlane.f32.xlu0 %v2038_v62  ;;  %v2056_v28 = vsel %vm473_vm2, %v412_v1, 1e+30  ;;  %v2074_v44 = vsel %vm473_vm2, %v442_v33, 1e+30 }
  0xe5   : > { %564 = vmin.xlane.f32.xlu2 %v2048_v0 }
  0xe8   : > { %v466_v22 = vpop.f32.mrf.mxu3 }
  0xe9   : > { %v467_v23 = vadd.f32 %v466_v22, %v1910_v30  ;;  %v413_v24 = vpop.f32.mrf.mxu0  ;;  %v443_v53 = vpop.f32.mrf.mxu1 }
  0xea   : > { %v414_v35 = vadd.f32 %v413_v24, %v1910_v30  ;;  %v444_v55 = vadd.f32 %v443_v53, %v1910_v30 }
  0xeb   : > { %v2064_v32 = vsel %vm473_vm2, %v467_v23, 1e+30 }
  0xec   : > { %544 = vmin.xlane.f32.xlu1 %v2060_v31  ;;  %566 = vmin.xlane.f32.xlu0 %v2064_v32  ;;  %v2082_v46 = vsel %vm473_vm2, %v414_v35, 1e+30  ;;  %v2096_v1 = vsel %vm473_vm2, %v444_v55, 1e+30 }
  0xed   : > { %522 = vmin.xlane.f32.xlu2 %v2056_v28 }
  0xf0   : > { %v468_v39 = vpop.f32.mrf.mxu3 }
  0xf1   : > { %v469_v42 = vadd.f32 %v468_v39, %v1910_v30  ;;  %v416_v43 = vpop.f32.mrf.mxu0 }
  0xf2   : > { %v417_v54 = vadd.f32 %v416_v43, %v1910_v30 }
  0xf3   : > { %v2078_v45 = vsel %vm473_vm2, %v469_v42, 1e+30 }
  0xf4   : > { %568 = vmin.xlane.f32.xlu1 %v2078_v45  ;;  %524 = vmin.xlane.f32.xlu0 %v2082_v46  ;;  %v2091_v60 = vsel %vm473_vm2, %v417_v54, 1e+30 }
  0xf5   : > { %546 = vmin.xlane.f32.xlu2 %v2074_v44 }
  0xf9   : > { %v418_v57 = vpop.f32.mrf.mxu0 }
  0xfa   : > { %v419_v61 = vadd.f32 %v418_v57, %v1910_v30 }
  0xfc   : > { %526 = vmin.xlane.f32.xlu1 %v2091_v60  ;;  %548 = vmin.xlane.f32.xlu0 %v2096_v1  ;;  %v2102_v5 = vsel %vm473_vm2, %v419_v61, 1e+30 }
  0xfd   : > { %528 = vmin.xlane.f32.xlu2 %v2102_v5 }
 0x118   : > { %v507_v22 = vpop.xlane.xlu0 %506 }
 0x119   : > { %vm570_vm3 = vcmp.le.f32.partialorder %v1916_v34, %v507_v22 }
 0x11a   : > { %v2107_v23 = vsel %vm570_vm3, %v1908_v29, 128 }
 0x11b   : > { %v635_v30 = vshra.s32 %v2107_v23, 16 }
 0x11d   : > { %v2110_v24 = vcvt.s32.f32 %v635_v30 }
 0x11f   : > { %v551_v27 = vpop.xlane.xlu1 %550  ;;  %638 = vmin.xlane.f32.xlu2 %v2110_v24 }
 0x120   : > { %vm592_vm4 = vcmp.le.f32.partialorder %v1927_v41, %v551_v27  ;;  %v531_v33 = vpop.xlane.xlu0 %530 }
 0x121   : > { %v2115_v35 = vsel %vm592_vm4, %v1908_v29, 128  ;;  %vm582_vm5 = vcmp.le.f32.partialorder %v1923_v40, %v531_v33 }
 0x122   : > { %v2119_v34 = vsel %vm582_vm5, %v1908_v29, 128  ;;  %v943_v39 = vshra.s32 %v2115_v35, 16 }
 0x123   : > { %v803_v42 = vshra.s32 %v2119_v34, 16 }
 0x124   : > { %v2123_v43 = vcvt.s32.f32 %v943_v39 }
 0x125   : > { %v2125_v53 = vcvt.s32.f32 %v803_v42 }
 0x126   : > { %946 = vmin.xlane.f32.xlu0 %v2123_v43 }
 0x127   : > { %v553_v41 = vpop.xlane.xlu2 %552  ;;  %v533_v54 = vpop.xlane.xlu1 %532  ;;  %806 = vmin.xlane.f32.xlu2 %v2125_v53 }
 0x128   : > { %v509_v55 = vpop.xlane.xlu0 %508  ;;  %vm583_vm7 = vcmp.le.f32.partialorder %v1940_v49, %v533_v54  ;;  %vm593_vm11 = vcmp.le.f32.partialorder %v1936_v48, %v553_v41 }
 0x129   : > { %vm571_vm6 = vcmp.le.f32.partialorder %v1946_v50, %v509_v55  ;;  %v2138_v22 = vsel %vm583_vm7, %v1908_v29, 128 }
 0x12a   : > { %v2131_v40 = vsel %vm571_vm6, %v1908_v29, 128  ;;  %v817_v49 = vshra.s32 %v2138_v22, 16 }
 0x12b   : > { %v649_v57 = vshra.s32 %v2131_v40, 16 }
 0x12d   : > { %v2135_v61 = vcvt.s32.f32 %v649_v57  ;;  %v2159_v57 = vcvt.s32.f32 %v817_v49 }
 0x12f   : > { %v535_v30 = vpop.xlane.xlu2 %534  ;;  %v511_v27 = vpop.xlane.xlu1 %510  ;;  %652 = vmin.xlane.f32.xlu1 %v2135_v61 }
 0x130   : > { %vm572_vm8 = vcmp.le.f32.partialorder %v1958_v58, %v511_v27  ;;  %v555_v33 = vpop.xlane.xlu0 %554  ;;  %vm584_vm10 = vcmp.le.f32.partialorder %v1954_v56, %v535_v30  ;;  %v2164_v56 = vsel %vm593_vm11, %v1908_v29, 128 }
 0x131   : > { %v2143_v50 = vsel %vm572_vm8, %v1908_v29, 128  ;;  %vm594_vm9 = vcmp.le.f32.partialorder %v1962_v59, %v555_v33  ;;  %v2157_v55 = vsel %vm584_vm10, %v1908_v29, 128  ;;  %v957_v49 = vshra.s32 %v2164_v56, 16 }
 0x132   : > { %v2149_v39 = vsel %vm594_vm9, %v1908_v29, 128  ;;  %v663_v42 = vshra.s32 %v2143_v50, 16  ;;  %v831_v27 = vshra.s32 %v2157_v55, 16 }
 0x133   : > { %v971_v54 = vshra.s32 %v2149_v39, 16  ;;  %v2180_v20 = vcvt.s32.f32 %v957_v49 }
 0x134   : > { %v2154_v58 = vcvt.s32.f32 %v663_v42 }
 0x135   : > { %v2161_v59 = vcvt.s32.f32 %v971_v54  ;;  %v2178_v54 = vcvt.s32.f32 %v831_v27 }
 0x136   : > { %666 = vmin.xlane.f32.xlu0 %v2154_v58 }
 0x137   : > { %v513_v30 = vpop.xlane.xlu1 %512  ;;  %820 = vmin.xlane.f32.xlu1 %v2159_v57  ;;  %974 = vmin.xlane.f32.xlu2 %v2161_v59 }
 0x138   : > { %vm573_vm12 = vcmp.le.f32.partialorder %v1972_v2, %v513_v30  ;;  %v515_v48 = vpop.xlane.xlu2 %514  ;;  %v537_v41 = vpop.xlane.xlu0 %536 }
 0x139   : > { %v2172_v33 = vsel %vm573_vm12, %v1908_v29, 128  ;;  %vm574_vm13 = vcmp.le.f32.partialorder %v1977_v3, %v515_v48  ;;  %vm585_vm14 = vcmp.le.f32.partialorder %v1981_v4, %v537_v41 }
 0x13a   : > { %v677_v42 = vshra.s32 %v2172_v33, 16  ;;  %v2185_v30 = vsel %vm574_vm13, %v1908_v29, 128  ;;  %v2188_v17 = vsel %vm585_vm14, %v1908_v29, 128 }
 0x13b   : > { %v691_v48 = vshra.s32 %v2185_v30, 16  ;;  %v845_v41 = vshra.s32 %v2188_v17, 16 }
 0x13c   : > { %v2182_v2 = vcvt.s32.f32 %v677_v42 }
 0x13d   : > { %v2202_v42 = vcvt.s32.f32 %v691_v48  ;;  %v2204_v11 = vcvt.s32.f32 %v845_v41 }
 0x13e   : > { %834 = vmin.xlane.f32.xlu0 %v2178_v54 }
 0x13f   : > { %v557_v14 = vpop.xlane.xlu1 %556  ;;  %960 = vmin.xlane.f32.xlu1 %v2180_v20  ;;  %680 = vmin.xlane.f32.xlu2 %v2182_v2 }
 0x140   : > { %vm595_vm15 = vcmp.le.f32.partialorder %v1989_v25, %v557_v14  ;;  %v559_v3 = vpop.xlane.xlu2 %558 }
 0x141   : > { %v2195_v4 = vsel %vm595_vm15, %v1908_v29, 128  ;;  %vm596_vm3 = vcmp.le.f32.partialorder %v1993_v26, %v559_v3 }
 0x142   : > { %v985_v27 = vshra.s32 %v2195_v4, 16  ;;  %v2230_v6 = vsel %vm596_vm3, %v1908_v29, 128 }
 0x144   : > { %v2200_v49 = vcvt.s32.f32 %v985_v27 }
 0x146   : > { %988 = vmin.xlane.f32.xlu0 %v2200_v49 }
 0x147   : > { %v539_v8 = vpop.xlane.xlu1 %538  ;;  %v561_v14 = vpop.xlane.xlu0 %560  ;;  %694 = vmin.xlane.f32.xlu1 %v2202_v42  ;;  %848 = vmin.xlane.f32.xlu2 %v2204_v11 }
 0x148   : > { %vm586_vm0 = vcmp.le.f32.partialorder %v2002_v36, %v539_v8  ;;  %vm597_vm1 = vcmp.le.f32.partialorder %v2006_v37, %v561_v14  ;;  %v517_v25 = vpop.xlane.xlu2 %516 }
 0x149   : > { %v2212_v27 = vsel %vm586_vm0, %v1908_v29, 128  ;;  %v2215_v48 = vsel %vm597_vm1, %v1908_v29, 128  ;;  %vm575_vm2 = vcmp.le.f32.partialorder %v2012_v38, %v517_v25 }
 0x14a   : > { %v2219_v41 = vsel %vm575_vm2, %v1908_v29, 128  ;;  %v859_v19 = vshra.s32 %v2212_v27, 16  ;;  %v1013_v36 = vshra.s32 %v2215_v48, 16 }
 0x14b   : > { %v705_v8 = vshra.s32 %v2219_v41, 16 }
 0x14c   : > { %v2227_v14 = vcvt.s32.f32 %v859_v19  ;;  %v2232_v9 = vcvt.s32.f32 %v1013_v36  ;;  %v999_v19 = vshra.s32 %v2230_v6, 16 }
 0x14d   : > { %v2225_v37 = vcvt.s32.f32 %v705_v8 }
 0x14f   : > { %v563_v38 = vpop.xlane.xlu1 %562  ;;  %v519_v25 = vpop.xlane.xlu0 %518  ;;  %708 = vmin.xlane.f32.xlu0 %v2225_v37  ;;  %862 = vmin.xlane.f32.xlu1 %v2227_v14 }
 0x150   : > { %vm576_vm4 = vcmp.le.f32.partialorder %v2020_v47, %v519_v25  ;;  %1016 = vmin.xlane.f32.xlu2 %v2232_v9  ;;  %v541_v26 = vpop.xlane.xlu2 %540  ;;  %vm598_vm6 = vcmp.le.f32.partialorder %v2024_v51, %v563_v38  ;;  %v2251_v25 = vcvt.s32.f32 %v999_v19 }
 0x151   : > { %v2239_v3 = vsel %vm576_vm4, %v1908_v29, 128  ;;  %vm587_vm5 = vcmp.le.f32.partialorder %v2030_v52, %v541_v26  ;;  %v2254_v15 = vsel %vm598_vm6, %v1908_v29, 128 }
 0x152   : > { %v2244_v8 = vsel %vm587_vm5, %v1908_v29, 128  ;;  %v719_v36 = vshra.s32 %v2239_v3, 16  ;;  %v1027_v19 = vshra.s32 %v2254_v15, 16 }
 0x153   : > { %v873_v12 = vshra.s32 %v2244_v8, 16 }
 0x154   : > { %v2256_v16 = vcvt.s32.f32 %v719_v36 }
 0x155   : > { %v2249_v47 = vcvt.s32.f32 %v873_v12 }
 0x157   : > { %v521_v52 = vpop.xlane.xlu1 %520  ;;  %v543_v26 = vpop.xlane.xlu0 %542  ;;  %876 = vmin.xlane.f32.xlu0 %v2249_v47  ;;  %1002 = vmin.xlane.f32.xlu1 %v2251_v25 }
 0x158   : > { %vm577_vm7 = vcmp.le.f32.partialorder %v2042_v63, %v521_v52  ;;  %vm588_vm8 = vcmp.le.f32.partialorder %v2038_v62, %v543_v26  ;;  %722 = vmin.xlane.f32.xlu2 %v2256_v16  ;;  %v565_v12 = vpop.xlane.xlu2 %564  ;;  %v2273_v63 = vcvt.s32.f32 %v1027_v19 }
 0x159   : > { %v2264_v51 = vsel %vm577_vm7, %v1908_v29, 128  ;;  %v2267_v38 = vsel %vm588_vm8, %v1908_v29, 128  ;;  %vm599_vm9 = vcmp.le.f32.partialorder %v2048_v0, %v565_v12 }
 0x15a   : > { %v733_v36 = vshra.s32 %v2264_v51, 16  ;;  %v887_v18 = vshra.s32 %v2267_v38, 16  ;;  %v2278_v52 = vsel %vm599_vm9, %v1908_v29, 128 }
 0x15b   : > { %2872 = vst [vmem:[#allocation22_spill] sm:$0xff] %v2278_v52 }
 0x15c   : > { %v2275_v62 = vcvt.s32.f32 %v733_v36  ;;  %v2280_v26 = vcvt.s32.f32 %v887_v18  ;;  %v1041_v18 = vshra.s32 %v2278_v52, 16 }
 0x15e   : > { %2871 = vst [vmem:[#allocation21_spill] sm:$0xff] %v2275_v62 }
 0x15f   : > { %v545_v21 = vpop.xlane.xlu1 %544  ;;  %v567_v7 = vpop.xlane.xlu0 %566  ;;  %1030 = vmin.xlane.f32.xlu0 %v2273_v63  ;;  %736 = vmin.xlane.f32.xlu1 %v2275_v62 }
 0x160   : > { %vm589_vm10 = vcmp.le.f32.partialorder %v2060_v31, %v545_v21  ;;  %vm600_vm11 = vcmp.le.f32.partialorder %v2064_v32, %v567_v7  ;;  %890 = vmin.xlane.f32.xlu2 %v2280_v26  ;;  %v523_v0 = vpop.xlane.xlu2 %522  ;;  %v2299_v7 = vcvt.s32.f32 %v1041_v18 }
 0x161   : > { %v2288_v12 = vsel %vm589_vm10, %v1908_v29, 128  ;;  %v2291_v19 = vsel %vm600_vm11, %v1908_v29, 128  ;;  %vm578_vm12 = vcmp.le.f32.partialorder %v2056_v28, %v523_v0 }
 0x162   : > { %2873 = vst [vmem:[#allocation23_spill] sm:$0xff] %v2291_v19  ;;  %v901_v36 = vshra.s32 %v2288_v12, 16  ;;  %v1055_v10 = vshra.s32 %v2291_v19, 16  ;;  %v2302_v31 = vsel %vm578_vm12, %v1908_v29, 128 }
 0x163   : > { %2874 = vst [vmem:[#allocation24_spill] sm:$0xff] %v2299_v7  ;;  %v747_v18 = vshra.s32 %v2302_v31, 16 }
 0x164   : > { %v2297_v21 = vcvt.s32.f32 %v901_v36  ;;  %v2304_v32 = vcvt.s32.f32 %v1055_v10 }
 0x166   : > { %2875 = vst [vmem:[#allocation25_spill] sm:$0xff] %v2304_v32 }
 0x167   : > { %v569_v13 = vpop.xlane.xlu1 %568  ;;  %v525_v62 = vpop.xlane.xlu0 %524  ;;  %904 = vmin.xlane.f32.xlu0 %v2297_v21  ;;  %1044 = vmin.xlane.f32.xlu1 %v2299_v7 }
 0x168   : > { %vm579_vm13 = vcmp.le.f32.partialorder %v2082_v46, %v525_v62  ;;  %1058 = vmin.xlane.f32.xlu2 %v2304_v32  ;;  %v547_v28 = vpop.xlane.xlu2 %546  ;;  %vm601_vm15 = vcmp.le.f32.partialorder %v2078_v45, %v569_v13  ;;  %v2321_v46 = vcvt.s32.f32 %v747_v18 }
 0x169   : > { %v2311_v0 = vsel %vm579_vm13, %v1908_v29, 128  ;;  %vm590_vm14 = vcmp.le.f32.partialorder %v2074_v44, %v547_v28  ;;  %v2326_v32 = vsel %vm601_vm15, %v1908_v29, 128 }
 0x16a   : > { %v2316_v10 = vsel %vm590_vm14, %v1908_v29, 128  ;;  %v761_v36 = vshra.s32 %v2311_v0, 16  ;;  %2876 = vst [vmem:[#allocation26_spill] sm:$0xff] %v2326_v32  ;;  %v1069_v18 = vshra.s32 %v2326_v32, 16 }
 0x16b   : > { %v915_v19 = vshra.s32 %v2316_v10, 16 }
 0x16c   : > { %v2328_v7 = vcvt.s32.f32 %v761_v36 }
 0x16d   : > { %v2323_v62 = vcvt.s32.f32 %v915_v19 }
 0x16f   : > { %v527_v44 = vpop.xlane.xlu1 %526  ;;  %v549_v28 = vpop.xlane.xlu0 %548  ;;  %750 = vmin.xlane.f32.xlu0 %v2321_v46  ;;  %918 = vmin.xlane.f32.xlu1 %v2323_v62 }
 0x170   : > { %vm580_vm0 = vcmp.le.f32.partialorder %v2091_v60, %v527_v44  ;;  %vm591_vm1 = vcmp.le.f32.partialorder %v2096_v1, %v549_v28  ;;  %764 = vmin.xlane.f32.xlu2 %v2328_v7  ;;  %v529_v13 = vpop.xlane.xlu2 %528  ;;  %v2345_v60 = vcvt.s32.f32 %v1069_v18 }
 0x171   : > { %v2336_v45 = vsel %vm580_vm0, %v1908_v29, 128  ;;  %v2339_v19 = vsel %vm591_vm1, %v1908_v29, 128  ;;  %vm581_vm2 = vcmp.le.f32.partialorder %v2102_v5, %v529_v13  ;;  %v634_v13 = vand.u32 65535, %v2107_v23 }
 0x172   : > { %v775_v36 = vshra.s32 %v2336_v45, 16  ;;  %v929_v52 = vshra.s32 %v2339_v19, 16  ;;  %2877 = vst [vmem:[#allocation27_spill] sm:$0xff] %v2345_v60  ;;  %v2350_v44 = vsel %vm581_vm2, %v1908_v29, 128  ;;  %v942_v29 = vand.u32 65535, %v2115_v35 }
 0x173   : > { %2878 = vst [vmem:[#allocation28_spill] sm:$0xff] %v2350_v44  ;;  %v789_v32 = vshra.s32 %v2350_v44, 16  ;;  %v648_v35 = vand.u32 65535, %v2131_v40 }
 0x174   : > { %v2347_v1 = vcvt.s32.f32 %v775_v36  ;;  %v2352_v28 = vcvt.s32.f32 %v929_v52  ;;  %v636_v36 = vcvt.s32.f32 %v634_v13 }
 0x175   : > { %v2358_v5 = vcvt.s32.f32 %v789_v32  ;;  %v944_v32 = vcvt.s32.f32 %v942_v29 }
 0x176   : > { %2879 = vst [vmem:[#allocation29_spill] sm:$0xff] %v2352_v28 }
 0x177   : > { %1072 = vmin.xlane.f32.xlu0 %v2345_v60  ;;  %778 = vmin.xlane.f32.xlu1 %v2347_v1  ;;  %2880 = vst [vmem:[#allocation30_spill] sm:$0xff] %v2358_v5  ;;  %v802_v60 = vand.u32 65535, %v2119_v34  ;;  %v650_v34 = vcvt.s32.f32 %v648_v35 }
 0x178   : > { %932 = vmin.xlane.f32.xlu2 %v2352_v28 }
 0x179   : > { %v804_v23 = vcvt.s32.f32 %v802_v60 }
 0x17f   : > { %792 = vmin.xlane.f32.xlu0 %v2358_v5 }
 0x192   : > { %v2362_v18 = vpop.xlane.xlu2 %638 }
 0x193   : > { %vm640_vm3 = vcmp.eq.f32.partialorder %v2110_v24, %v2362_v18 }
 0x194   : > { %v641_v52 = vsel %vm640_vm3, %v636_v36, inf  ;;  %v662_v36 = vand.u32 65535, %v2143_v50  ;;  %v830_v50 = vand.u32 65535, %v2157_v55 }
 0x195   : > { %642 = vmin.xlane.f32.xlu0 %v641_v52 }
 0x199   : > { %v2368_v28 = vpop.xlane.xlu0 %946 }
 0x19a   : > { %v2370_v44 = vpop.xlane.xlu2 %806  ;;  %vm948_vm4 = vcmp.eq.f32.partialorder %v2123_v43, %v2368_v28  ;;  %v816_v43 = vand.u32 65535, %v2138_v22  ;;  %v956_v22 = vand.u32 65535, %v2164_v56  ;;  %v984_v56 = vand.u32 65535, %v2195_v4 }
 0x19b   : > { %v949_v5 = vsel %vm948_vm4, %v944_v32, inf  ;;  %vm808_vm5 = vcmp.eq.f32.partialorder %v2125_v53, %v2370_v44  ;;  %v664_v53 = vcvt.s32.f32 %v662_v36  ;;  %v676_v36 = vand.u32 65535, %v2172_v33 }
 0x19c   : > { %950 = vmin.xlane.f32.xlu2 %v949_v5  ;;  %v809_v24 = vsel %vm808_vm5, %v804_v23, inf  ;;  %v818_v40 = vcvt.s32.f32 %v816_v43 }
 0x19d   : > { %810 = vmin.xlane.f32.xlu0 %v809_v24  ;;  %v832_v24 = vcvt.s32.f32 %v830_v50 }
 0x1a2   : > { %v2377_v13 = vpop.xlane.xlu1 %652 }
 0x1a3   : > { %vm654_vm6 = vcmp.eq.f32.partialorder %v2135_v61, %v2377_v13 }
 0x1a4   : > { %v655_v29 = vsel %vm654_vm6, %v650_v34, inf }
 0x1a5   : > { %656 = vmin.xlane.f32.xlu2 %v655_v29 }
 0x1a9   : > { %v2383_v60 = vpop.xlane.xlu0 %666 }
 0x1aa   : > { %v2385_v5 = vpop.xlane.xlu1 %820  ;;  %v2387_v52 = vpop.xlane.xlu2 %974  ;;  %vm668_vm7 = vcmp.eq.f32.partialorder %v2154_v58, %v2383_v60  ;;  %v958_v58 = vcvt.s32.f32 %v956_v22 }
 0x1ab   : > { %v669_v32 = vsel %vm668_vm7, %v664_v53, inf  ;;  %vm822_vm8 = vcmp.eq.f32.partialorder %v2159_v57, %v2385_v5  ;;  %v970_v57 = vand.u32 65535, %v2149_v39  ;;  %vm976_vm11 = vcmp.eq.f32.partialorder %v2161_v59, %v2387_v52 }
 0x1ac   : > { %670 = vmin.xlane.f32.xlu1 %v669_v32  ;;  %v823_v61 = vsel %vm822_vm8, %v818_v40, inf  ;;  %v986_v53 = vcvt.s32.f32 %v984_v56  ;;  %v678_v39 = vcvt.s32.f32 %v676_v36  ;;  %v690_v32 = vand.u32 65535, %v2185_v30 }
 0x1ad   : > { %824 = vmin.xlane.f32.xlu2 %v823_v61  ;;  %v844_v61 = vand.u32 65535, %v2188_v17 }
 0x1ae   : > { %v692_v50 = vcvt.s32.f32 %v690_v32 }
 0x1b1   : > { %v2395_v23 = vpop.xlane.xlu0 %834 }
 0x1b2   : > { %v2397_v35 = vpop.xlane.xlu1 %960  ;;  %v2399_v34 = vpop.xlane.xlu2 %680  ;;  %vm836_vm9 = vcmp.eq.f32.partialorder %v2178_v54, %v2395_v23  ;;  %v972_v54 = vcvt.s32.f32 %v970_v57 }
 0x1b3   : > { %v837_v29 = vsel %vm836_vm9, %v832_v24, inf  ;;  %vm962_vm10 = vcmp.eq.f32.partialorder %v2180_v20, %v2397_v35  ;;  %vm682_vm12 = vcmp.eq.f32.partialorder %v2182_v2, %v2399_v34  ;;  %v704_v2 = vand.u32 65535, %v2219_v41 }
 0x1b4   : > { %838 = vmin.xlane.f32.xlu1 %v837_v29  ;;  %v963_v55 = vsel %vm962_vm10, %v958_v58, inf  ;;  %v977_v4 = vsel %vm976_vm11, %v972_v54, inf  ;;  %v683_v59 = vsel %vm682_vm12, %v678_v39, inf  ;;  %v846_v24 = vcvt.s32.f32 %v844_v61 }
 0x1b5   : > { %964 = vmin.xlane.f32.xlu0 %v963_v55  ;;  %v706_v58 = vcvt.s32.f32 %v704_v2  ;;  %v872_v55 = vand.u32 65535, %v2244_v8  ;;  %v1026_v8 = vand.u32 65535, %v2254_v15 }
 0x1b7   : > { %v874_v54 = vcvt.s32.f32 %v872_v55  ;;  %v1028_v32 = vcvt.s32.f32 %v1026_v8 }
 0x1b9   : > { %v2410_v43 = vpop.xlane.xlu0 %988 }
 0x1ba   : > { %v2414_v20 = vpop.xlane.xlu1 %694  ;;  %v2416_v40 = vpop.xlane.xlu2 %848  ;;  %vm990_vm13 = vcmp.eq.f32.partialorder %v2200_v49, %v2410_v43 }
 0x1bb   : > { %v991_v33 = vsel %vm990_vm13, %v986_v53, inf  ;;  %vm696_vm14 = vcmp.eq.f32.partialorder %v2202_v42, %v2414_v20  ;;  %vm850_vm15 = vcmp.eq.f32.partialorder %v2204_v11, %v2416_v40  ;;  %v858_v42 = vand.u32 65535, %v2212_v27 }
 0x1bc   : > { %978 = vmin.xlane.f32.xlu1 %v977_v4  ;;  %992 = vmin.xlane.f32.xlu2 %v991_v33  ;;  %v697_v30 = vsel %vm696_vm14, %v692_v50, inf  ;;  %v851_v17 = vsel %vm850_vm15, %v846_v24, inf  ;;  %v998_v11 = vand.u32 65535, %v2230_v6  ;;  %v718_v4 = vand.u32 65535, %v2239_v3 }
 0x1bd   : > { %684 = vmin.xlane.f32.xlu0 %v683_v59  ;;  %v860_v57 = vcvt.s32.f32 %v858_v42 }
 0x1be   : > { %v720_v33 = vcvt.s32.f32 %v718_v4 }
 0x1c2   : > { %v2427_v49 = vpop.xlane.xlu1 %862  ;;  %v2429_v22 = vpop.xlane.xlu0 %708 }
 0x1c3   : > { %v2431_v29 = vpop.xlane.xlu2 %1016  ;;  %vm710_vm0 = vcmp.eq.f32.partialorder %v2225_v37, %v2429_v22  ;;  %vm864_vm1 = vcmp.eq.f32.partialorder %v2227_v14, %v2427_v49  ;;  %v1000_v37 = vcvt.s32.f32 %v998_v11  ;;  %v1012_v14 = vand.u32 65535, %v2215_v48 }
 0x1c4   : > { %698 = vmin.xlane.f32.xlu2 %v697_v30  ;;  %v711_v41 = vsel %vm710_vm0, %v706_v58, inf  ;;  %v865_v39 = vsel %vm864_vm1, %v860_v57, inf  ;;  %vm1018_vm5 = vcmp.eq.f32.partialorder %v2232_v9, %v2431_v29  ;;  %v732_v9 = vand.u32 65535, %v2264_v51 }
 0x1c5   : > { %852 = vmin.xlane.f32.xlu0 %v851_v17  ;;  %712 = vmin.xlane.f32.xlu1 %v711_v41  ;;  %v1014_v59 = vcvt.s32.f32 %v1012_v14  ;;  %v746_v41 = vand.u32 65535, %v2302_v31  ;;  %v914_v51 = vand.u32 65535, %v2316_v10 }
 0x1c6   : > { %v734_v30 = vcvt.s32.f32 %v732_v9 }
 0x1c7   : > { %v1019_v48 = vsel %vm1018_vm5, %v1014_v59, inf  ;;  %v916_v55 = vcvt.s32.f32 %v914_v51  ;;  %v748_v57 = vcvt.s32.f32 %v746_v41 }
 0x1ca   : > { %v2440_v56 = vpop.xlane.xlu1 %1002  ;;  %v2442_v36 = vpop.xlane.xlu0 %876 }
 0x1cb   : > { %v2444_v53 = vpop.xlane.xlu2 %722  ;;  %vm1004_vm2 = vcmp.eq.f32.partialorder %v2251_v25, %v2440_v56  ;;  %vm878_vm3 = vcmp.eq.f32.partialorder %v2249_v47, %v2442_v36 }
 0x1cc   : > { %866 = vmin.xlane.f32.xlu2 %v865_v39  ;;  %v1005_v6 = vsel %vm1004_vm2, %v1000_v37, inf  ;;  %v879_v27 = vsel %vm878_vm3, %v874_v54, inf  ;;  %vm724_vm4 = vcmp.eq.f32.partialorder %v2256_v16, %v2444_v53  ;;  %v886_v16 = vand.u32 65535, %v2267_v38 }
 0x1cd   : > { %1006 = vmin.xlane.f32.xlu0 %v1005_v6  ;;  %880 = vmin.xlane.f32.xlu1 %v879_v27  ;;  %v725_v15 = vsel %vm724_vm4, %v720_v33, inf  ;;  %v760_v39 = vand.u32 65535, %v2311_v0  ;;  %v774_v6 = vand.u32 65535, %v2336_v45  ;;  %v2882_v33 = vld [vmem:[#allocation29_spill] sm:$0xff] }
 0x1ce   : > { %v888_v24 = vcvt.s32.f32 %v886_v16  ;;  %v2886_v16 = vld [vmem:[#allocation24_spill] sm:$0xff] }
 0x1cf   : > { %v776_v14 = vcvt.s32.f32 %v774_v6 }
 0x1d2   : > { %v2457_v25 = vpop.xlane.xlu1 %736  ;;  %v2459_v47 = vpop.xlane.xlu0 %1030 }
 0x1d3   : > { %v2461_v61 = vpop.xlane.xlu2 %890  ;;  %vm1032_vm6 = vcmp.eq.f32.partialorder %v2273_v63, %v2459_v47  ;;  %v2881_v63 = vld [vmem:[#allocation21_spill] sm:$0xff] }
 0x1d4   : > { %v1033_v3 = vsel %vm1032_vm6, %v1028_v32, inf  ;;  %vm892_vm7 = vcmp.eq.f32.partialorder %v2280_v26, %v2461_v61  ;;  %vm738_vm8 = vcmp.eq.f32.partialorder %v2881_v63, %v2457_v25  ;;  %v900_v26 = vand.u32 65535, %v2288_v12  ;;  %v2884_v32 = vld [vmem:[#allocation28_spill] sm:$0xff] }
 0x1d5   : > { %726 = vmin.xlane.f32.xlu0 %v725_v15  ;;  %1020 = vmin.xlane.f32.xlu1 %v1019_v48  ;;  %v893_v17 = vsel %vm892_vm7, %v888_v24, inf  ;;  %v739_v38 = vsel %vm738_vm8, %v734_v30, inf  ;;  %v788_v15 = vand.u32 65535, %v2884_v32  ;;  %v2885_v48 = vld [vmem:[#allocation26_spill] sm:$0xff]  ;;  %v2887_v24 = vld [vmem:[#allocation27_spill] sm:$0xff] }
 0x1d6   : > { %1034 = vmin.xlane.f32.xlu2 %v1033_v3  ;;  %v902_v31 = vcvt.s32.f32 %v900_v26  ;;  %v1068_v3 = vand.u32 65535, %v2885_v48  ;;  %v2889_v26 = vld [vmem:[#allocation23_spill] sm:$0xff] }
 0x1d7   : > { %v790_v63 = vcvt.s32.f32 %v788_v15 }
 0x1d8   : > { %v1070_v30 = vcvt.s32.f32 %v1068_v3 }
 0x1da   : > { %v2469_v2 = vpop.xlane.xlu1 %1044  ;;  %v2471_v50 = vpop.xlane.xlu0 %904 }
 0x1db   : > { %v2475_v58 = vpop.xlane.xlu2 %1058  ;;  %vm906_vm9 = vcmp.eq.f32.partialorder %v2297_v21, %v2471_v50  ;;  %v928_v21 = vand.u32 65535, %v2339_v19  ;;  %vm1046_vm15 = vcmp.eq.f32.partialorder %v2886_v16, %v2469_v2 }
 0x1dc   : > { %v907_v54 = vsel %vm906_vm9, %v902_v31, inf }
 0x1dd   : > { %894 = vmin.xlane.f32.xlu1 %v893_v17  ;;  %v930_v0 = vcvt.s32.f32 %v928_v21  ;;  %v2888_v17 = vld [vmem:[#allocation30_spill] sm:$0xff] }
 0x1de   : > { %740 = vmin.xlane.f32.xlu2 %v739_v38 }
 0x1e2   : > { %v2480_v42 = vpop.xlane.xlu1 %918  ;;  %v2482_v11 = vpop.xlane.xlu0 %750 }
 0x1e3   : > { %v2486_v37 = vpop.xlane.xlu2 %764  ;;  %vm920_vm10 = vcmp.eq.f32.partialorder %v2323_v62, %v2480_v42  ;;  %vm752_vm11 = vcmp.eq.f32.partialorder %v2321_v46, %v2482_v11  ;;  %v762_v46 = vcvt.s32.f32 %v760_v39 }
 0x1e4   : > { %v921_v10 = vsel %vm920_vm10, %v916_v55, inf  ;;  %v753_v12 = vsel %vm752_vm11, %v748_v57, inf  ;;  %vm766_vm12 = vcmp.eq.f32.partialorder %v2328_v7, %v2486_v37  ;;  %v2883_v7 = vld [vmem:[#allocation22_spill] sm:$0xff]  ;;  %v1054_v55 = vand.u32 65535, %v2889_v26  ;;  %v2890_v57 = vld [vmem:[#allocation25_spill] sm:$0xff] }
 0x1e5   : > { %922 = vmin.xlane.f32.xlu0 %v921_v10  ;;  %754 = vmin.xlane.f32.xlu1 %v753_v12  ;;  %v767_v4 = vsel %vm766_vm12, %v762_v46, inf  ;;  %v1040_v59 = vand.u32 65535, %v2883_v7  ;;  %vm1060_vm2 = vcmp.eq.f32.partialorder %v2890_v57, %v2475_v58  ;;  %v645_v12 = vcvt.f32.s32 %v2362_v18 }
 0x1e6   : > { %908 = vmin.xlane.f32.xlu2 %v907_v54  ;;  %v1056_v31 = vcvt.s32.f32 %v1054_v55  ;;  %v953_v46 = vcvt.f32.s32 %v2368_v28  ;;  %v659_v18 = vcvt.f32.s32 %v2377_v13  ;;  %v673_v28 = vcvt.f32.s32 %v2383_v60 }
 0x1e7   : > { %v1042_v9 = vcvt.s32.f32 %v1040_v59  ;;  %v646_v39 = vshll.u32 %v645_v12, 16  ;;  %v841_v13 = vcvt.f32.s32 %v2395_v23  ;;  %v967_v26 = vcvt.f32.s32 %v2397_v35 }
 0x1e8   : > { %v1061_v10 = vsel %vm1060_vm2, %v1056_v31, inf  ;;  %v660_v48 = vshll.u32 %v659_v18, 16 }
 0x1e9   : > { %v1047_v38 = vsel %vm1046_vm15, %v1042_v9, inf  ;;  %v842_v57 = vshll.u32 %v841_v13, 16 }
 0x1ea   : > { %v2497_v62 = vpop.xlane.xlu1 %778  ;;  %v2499_v27 = vpop.xlane.xlu0 %1072 }
 0x1eb   : > { %v2501_v8 = vpop.xlane.xlu2 %932  ;;  %vm780_vm13 = vcmp.eq.f32.partialorder %v2347_v1, %v2497_v62  ;;  %vm1074_vm0 = vcmp.eq.f32.partialorder %v2887_v24, %v2499_v27  ;;  %v674_v24 = vshll.u32 %v673_v28, 16 }
 0x1ec   : > { %v781_v45 = vsel %vm780_vm13, %v776_v14, inf  ;;  %vm934_vm14 = vcmp.eq.f32.partialorder %v2882_v33, %v2501_v8  ;;  %v1075_v51 = vsel %vm1074_vm0, %v1070_v30, inf  ;;  %v813_v14 = vcvt.f32.s32 %v2370_v44 }
 0x1ed   : > { %768 = vmin.xlane.f32.xlu0 %v767_v4  ;;  %v935_v19 = vsel %vm934_vm14, %v930_v0, inf  ;;  %v954_v4 = vshll.u32 %v953_v46, 16  ;;  %v827_v44 = vcvt.f32.s32 %v2385_v5  ;;  %v687_v46 = vcvt.f32.s32 %v2399_v34 }
 0x1ee   : > { %782 = vmin.xlane.f32.xlu2 %v781_v45  ;;  %936 = vmin.xlane.f32.xlu1 %v935_v19  ;;  %v814_v19 = vshll.u32 %v813_v14, 16  ;;  %v715_v34 = vcvt.f32.s32 %v2429_v22  ;;  %v883_v22 = vcvt.f32.s32 %v2442_v36  ;;  %v1037_v36 = vcvt.f32.s32 %v2459_v47 }
 0x1f2   : > { %v2512_v1 = vpop.xlane.xlu0 %792 }
 0x1f3   : > { %vm794_vm1 = vcmp.eq.f32.partialorder %v2888_v17, %v2512_v1  ;;  %v828_v17 = vshll.u32 %v827_v44, 16 }
 0x1f4   : > { %v795_v41 = vsel %vm794_vm1, %v790_v63, inf }
 0x1f5   : > { %1048 = vmin.xlane.f32.xlu0 %v1047_v38 }
 0x1f6   : > { %1076 = vmin.xlane.f32.xlu2 %v1075_v51  ;;  %796 = vmin.xlane.f32.xlu1 %v795_v41 }
 0x1fe   : > { %1062 = vmin.xlane.f32.xlu1 %v1061_v10  ;;  %v968_v10 = vshll.u32 %v967_v26, 16 }
 0x208   : > { %v643_v54 = vpop.xlane.xlu0 %642 }
 0x209   : > { %v644_v6 = vcvt.f32.s32 %v643_v54 }
 0x20b   : > { %v2522_v21 = vadd.s32 %v646_v39, %v644_v6  ;;  %v981_v39 = vcvt.f32.s32 %v2387_v52  ;;  %v995_v6 = vcvt.f32.s32 %v2410_v43  ;;  %v701_v52 = vcvt.f32.s32 %v2414_v20 }
 0x20c   : > { %v855_v43 = vcvt.f32.s32 %v2416_v40  ;;  %v869_v20 = vcvt.f32.s32 %v2427_v49  ;;  %v1009_v40 = vcvt.f32.s32 %v2440_v56  ;;  %v1023_v49 = vcvt.f32.s32 %v2431_v29 }
 0x20d   : > { %v996_v35 = vshll.u32 %v995_v6, 16  ;;  %v702_v28 = vshll.u32 %v701_v52, 16  ;;  %v884_v6 = vshll.u32 %v883_v22, 16  ;;  %v729_v56 = vcvt.f32.s32 %v2444_v53 }
 0x20e   : > { %v897_v29 = vcvt.f32.s32 %v2461_v61  ;;  %v743_v53 = vcvt.f32.s32 %v2457_v25  ;;  %v925_v22 = vcvt.f32.s32 %v2480_v42  ;;  %v771_v42 = vcvt.f32.s32 %v2486_v37 }
 0x20f   : > { %v951_v0 = vpop.xlane.xlu2 %950  ;;  %v1051_v37 = vcvt.f32.s32 %v2469_v2  ;;  %v1065_v2 = vcvt.f32.s32 %v2475_v58 }
 0x210   : > { %v952_v45 = vcvt.f32.s32 %v951_v0  ;;  %v811_v33 = vpop.xlane.xlu0 %810  ;;  %v982_v0 = vshll.u32 %v981_v39, 16  ;;  %v1010_v39 = vshll.u32 %v1009_v40, 16 }
 0x211   : > { %v812_v7 = vcvt.f32.s32 %v811_v33 }
 0x212   : > { %v2526_v59 = vadd.s32 %v954_v4, %v952_v45 }
 0x213   : > { %v2528_v32 = vadd.s32 %v814_v19, %v812_v7  ;;  %v688_v19 = vshll.u32 %v687_v46, 16 }
 0x218   : > { %v657_v15 = vpop.xlane.xlu2 %656 }
 0x219   : > { %v658_v3 = vcvt.f32.s32 %v657_v15 }
 0x21b   : > { %v2531_v16 = vadd.s32 %v660_v48, %v658_v3 }
 0x21f   : > { %v671_v9 = vpop.xlane.xlu1 %670 }
 0x220   : > { %v672_v63 = vcvt.f32.s32 %v671_v9  ;;  %v825_v30 = vpop.xlane.xlu2 %824 }
 0x221   : > { %v826_v38 = vcvt.f32.s32 %v825_v30  ;;  %v716_v30 = vshll.u32 %v715_v34, 16  ;;  %v1038_v34 = vshll.u32 %v1037_v36, 16 }
 0x222   : > { %v2535_v41 = vadd.s32 %v674_v24, %v672_v63  ;;  %v856_v63 = vshll.u32 %v855_v43, 16 }
 0x223   : > { %v2537_v51 = vadd.s32 %v828_v17, %v826_v38 }
 0x227   : > { %v839_v55 = vpop.xlane.xlu1 %838 }
 0x228   : > { %v840_v31 = vcvt.f32.s32 %v839_v55  ;;  %v965_v60 = vpop.xlane.xlu0 %964 }
 0x229   : > { %v966_v5 = vcvt.f32.s32 %v965_v60 }
 0x22a   : > { %v2541_v12 = vadd.s32 %v842_v57, %v840_v31  ;;  %v870_v31 = vshll.u32 %v869_v20, 16 }
 0x22b   : > { %v2543_v54 = vadd.s32 %v968_v10, %v966_v5 }
 0x22f   : > { %v979_v14 = vpop.xlane.xlu1 %978  ;;  %v993_v23 = vpop.xlane.xlu2 %992 }
 0x230   : > { %v980_v4 = vcvt.f32.s32 %v979_v14  ;;  %v994_v45 = vcvt.f32.s32 %v993_v23  ;;  %v685_v33 = vpop.xlane.xlu0 %684 }
 0x231   : > { %v686_v7 = vcvt.f32.s32 %v685_v33  ;;  %v1024_v33 = vshll.u32 %v1023_v49, 16 }
 0x232   : > { %v2548_v18 = vadd.s32 %v982_v0, %v980_v4  ;;  %v2550_v15 = vadd.s32 %v996_v35, %v994_v45 }
 0x233   : > { %v2552_v48 = vadd.s32 %v688_v19, %v686_v7  ;;  %v730_v19 = vshll.u32 %v729_v56, 16 }
 0x237   : > { %v699_v3 = vpop.xlane.xlu2 %698 }
 0x238   : > { %v700_v44 = vcvt.f32.s32 %v699_v3  ;;  %v713_v9 = vpop.xlane.xlu1 %712  ;;  %v853_v24 = vpop.xlane.xlu0 %852 }
 0x239   : > { %v714_v17 = vcvt.f32.s32 %v713_v9  ;;  %v854_v38 = vcvt.f32.s32 %v853_v24  ;;  %v898_v24 = vshll.u32 %v897_v29, 16 }
 0x23a   : > { %v2557_v13 = vadd.s32 %v702_v28, %v700_v44 }
 0x23b   : > { %v2559_v26 = vadd.s32 %v716_v30, %v714_v17  ;;  %v2561_v55 = vadd.s32 %v856_v63, %v854_v38  ;;  %v744_v17 = vshll.u32 %v743_v53, 16 }
 0x23f   : > { %v867_v57 = vpop.xlane.xlu2 %866 }
 0x240   : > { %v868_v60 = vcvt.f32.s32 %v867_v57  ;;  %v881_v10 = vpop.xlane.xlu1 %880  ;;  %v1007_v5 = vpop.xlane.xlu0 %1006  ;;  %v757_v57 = vcvt.f32.s32 %v2482_v11  ;;  %v785_v11 = vcvt.f32.s32 %v2497_v62  ;;  %v1079_v62 = vcvt.f32.s32 %v2499_v27 }
 0x241   : > { %v882_v46 = vcvt.f32.s32 %v881_v10  ;;  %v1008_v14 = vcvt.f32.s32 %v1007_v5  ;;  %v926_v10 = vshll.u32 %v925_v22, 16 }
 0x242   : > { %v2566_v23 = vadd.s32 %v870_v31, %v868_v60  ;;  %v911_v31 = vcvt.f32.s32 %v2471_v50  ;;  %v758_v25 = vshll.u32 %v757_v57, 16  ;;  %v939_v50 = vcvt.f32.s32 %v2501_v8 }
 0x243   : > { %v2568_v0 = vadd.s32 %v884_v6, %v882_v46  ;;  %v2570_v35 = vadd.s32 %v1010_v39, %v1008_v14  ;;  %v799_v8 = vcvt.f32.s32 %v2512_v1  ;;  %v1080_v22 = vshll.u32 %v1079_v62, 16 }
 0x244   : > { %v912_v46 = vshll.u32 %v911_v31, 16 }
 0x245   : > { %v800_v57 = vshll.u32 %v799_v8, 16 }
 0x248   : > { %v1021_v4 = vpop.xlane.xlu1 %1020  ;;  %v727_v45 = vpop.xlane.xlu0 %726 }
 0x249   : > { %v1022_v7 = vcvt.f32.s32 %v1021_v4  ;;  %v1035_v52 = vpop.xlane.xlu2 %1034  ;;  %v728_v43 = vcvt.f32.s32 %v727_v45  ;;  %v772_v45 = vshll.u32 %v771_v42, 16 }
 0x24a   : > { %v1036_v3 = vcvt.f32.s32 %v1035_v52  ;;  %v786_v52 = vshll.u32 %v785_v11, 16 }
 0x24b   : > { %v2575_v28 = vadd.s32 %v1024_v33, %v1022_v7  ;;  %v2577_v44 = vadd.s32 %v730_v19, %v728_v43  ;;  %v940_v43 = vshll.u32 %v939_v50, 16 }
 0x24c   : > { %v2579_v9 = vadd.s32 %v1038_v34, %v1036_v3 }
 0x250   : > { %v895_v47 = vpop.xlane.xlu1 %894 }
 0x251   : > { %v896_v63 = vcvt.f32.s32 %v895_v47  ;;  %v741_v30 = vpop.xlane.xlu2 %740 }
 0x252   : > { %v742_v38 = vcvt.f32.s32 %v741_v30 }
 0x253   : > { %v2583_v20 = vadd.s32 %v898_v24, %v896_v63  ;;  %v1052_v63 = vshll.u32 %v1051_v37, 16 }
 0x254   : > { %v2585_v40 = vadd.s32 %v744_v17, %v742_v38 }
 0x258   : > { %v755_v60 = vpop.xlane.xlu1 %754  ;;  %v923_v61 = vpop.xlane.xlu0 %922 }
 0x259   : > { %v909_v5 = vpop.xlane.xlu2 %908  ;;  %v756_v39 = vcvt.f32.s32 %v755_v60  ;;  %v924_v6 = vcvt.f32.s32 %v923_v61 }
 0x25a   : > { %v910_v14 = vcvt.f32.s32 %v909_v5  ;;  %v1066_v5 = vshll.u32 %v1065_v2, 16 }
 0x25b   : > { %v2590_v49 = vadd.s32 %v758_v25, %v756_v39  ;;  %v2592_v56 = vadd.s32 %v926_v10, %v924_v6 }
 0x25c   : > { %v2594_v36 = vadd.s32 %v912_v46, %v910_v14 }
 0x260   : > { %v769_v4 = vpop.xlane.xlu0 %768 }
 0x261   : > { %v783_v33 = vpop.xlane.xlu2 %782  ;;  %v937_v19 = vpop.xlane.xlu1 %936  ;;  %v770_v7 = vcvt.f32.s32 %v769_v4 }
 0x262   : > { %v784_v34 = vcvt.f32.s32 %v783_v33  ;;  %v938_v3 = vcvt.f32.s32 %v937_v19 }
 0x263   : > { %v2599_v29 = vadd.s32 %v772_v45, %v770_v7 }
 0x264   : > { %v2601_v53 = vadd.s32 %v786_v52, %v784_v34  ;;  %v2603_v47 = vadd.s32 %v940_v43, %v938_v3 }
 0x268   : > { %v1049_v24 = vpop.xlane.xlu0 %1048 }
 0x269   : > { %v1077_v30 = vpop.xlane.xlu2 %1076  ;;  %v797_v17 = vpop.xlane.xlu1 %796  ;;  %v1050_v38 = vcvt.f32.s32 %v1049_v24 }
 0x26a   : > { %v1078_v31 = vcvt.f32.s32 %v1077_v30  ;;  %v798_v60 = vcvt.f32.s32 %v797_v17 }
 0x26b   : > { %v2608_v61 = vadd.s32 %v1052_v63, %v1050_v38 }
 0x26c   : > { %v2610_v10 = vadd.s32 %v1080_v22, %v1078_v31  ;;  %v2612_v25 = vadd.s32 %v800_v57, %v798_v60 }
 0x270   : > { %1085 = sbr.rel (%p1573_p7) target bundleno = 660 (0x294), region = 40 }
 0x271   : > { %v1063_v27 = vpop.xlane.xlu1 %1062 }
 0x272   : > { %v1064_v1 = vcvt.f32.s32 %v1063_v27 }
 0x274   : > { %v2615_v39 = vadd.s32 %v1066_v5, %v1064_v1 }
 0x275   : > { %v2891_v6 = vld [vmem:[#allocation20_spill] sm:$0xff]  ;;  %vm1089_vm3 = vcmask 130112   ;;  %vm1093_vm4 = vcmask 195712   ;;  %vm1097_vm5 = vcmask 261312   ;;  %vm1101_vm6 = vcmask 326912  }
 0x276   : > { %v1086_v46 = vperm.slane %v2522_v21, %v2891_v6  ;;  %v2621_v14 = vadd.s32 4294967288, %v2891_v6  ;;  %v2624_v42 = vadd.s32 4294967280, %v2891_v6  ;;  %v2627_v58 = vadd.s32 4294967272, %v2891_v6 }
 0x277   : > { %v2630_v11 = vadd.s32 4294967264, %v2891_v6  ;;  %v2637_v45 = vadd.s32 4294967256, %v2891_v6  ;;  %v2644_v7 = vadd.s32 4294967248, %v2891_v6  ;;  %vm1105_vm7 = vcmask 392512  }
 0x278   : > { %v1088_v50 = vperm.slane %v2531_v16, %v2621_v14  ;;  %v1092_v4 = vperm.slane %v2535_v41, %v2624_v42  ;;  %v1096_v33 = vperm.slane %v2552_v48, %v2627_v58  ;;  %v2650_v34 = vadd.s32 4294967240, %v2891_v6 }
 0x279   : > { %v1100_v19 = vperm.slane %v2557_v13, %v2630_v11  ;;  %v1104_v43 = vperm.slane %v2559_v26, %v2637_v45  ;;  %v1108_v37 = vperm.slane %v2577_v44, %v2644_v7  ;;  %vm1109_vm8 = vcmask 458112  }
 0x27a   : > { %v1090_v52 = vsel %vm1089_vm3, %v1088_v50, %v1086_v46  ;;  %v1115_v62 = vadd.s32 4294967232, %v2891_v6  ;;  %v1112_v24 = vperm.slane %v2585_v40, %v2650_v34  ;;  %vm1113_vm9 = vcmask 523712  }
 0x27b   : > { %v1094_v3 = vsel %vm1093_vm4, %v1092_v4, %v1090_v52  ;;  %v1119_v63 = vadd.s32 4294967224, %v2891_v6  ;;  %vm1117_vm10 = vcmask 589312   ;;  %v1123_v38 = vadd.s32 4294967216, %v2891_v6 }
 0x27c   : > { %v1098_v8 = vsel %vm1097_vm5, %v1096_v33, %v1094_v3  ;;  %v1116_v17 = vperm.slane %v2590_v49, %v1115_v62  ;;  %vm1121_vm11 = vcmask 654912   ;;  %v1127_v31 = vadd.s32 4294967208, %v2891_v6 }
 0x27d   : > { %v1102_v30 = vsel %vm1101_vm6, %v1100_v19, %v1098_v8  ;;  %v1120_v57 = vperm.slane %v2599_v29, %v1119_v63  ;;  %v1124_v2 = vperm.slane %v2601_v53, %v1123_v38  ;;  %vm1125_vm12 = vcmask 720512  }
 0x27e   : > { %v1106_v22 = vsel %vm1105_vm7, %v1104_v43, %v1102_v30  ;;  %v1131_v27 = vadd.s32 4294967200, %v2891_v6  ;;  %v1128_v1 = vperm.slane %v2612_v25, %v1127_v31  ;;  %vm1129_vm13 = vcmask 786112  }
 0x27f   : > { %v1110_v60 = vsel %vm1109_vm8, %v1108_v37, %v1106_v22  ;;  %v1135_v46 = vadd.s32 4294967192, %v2891_v6  ;;  %vm1133_vm14 = vcmask 851712   ;;  %v1139_v33 = vadd.s32 4294967184, %v2891_v6 }
 0x280   : > { %v1114_v5 = vsel %vm1113_vm9, %v1112_v24, %v1110_v60  ;;  %v1132_v4 = vperm.slane %v2528_v32, %v1131_v27  ;;  %vm1137_vm15 = vcmask 917312   ;;  %v1143_v43 = vadd.s32 4294967176, %v2891_v6 }
 0x281   : > { %v1118_v50 = vsel %vm1117_vm10, %v1116_v17, %v1114_v5  ;;  %v1136_v52 = vperm.slane %v2537_v51, %v1135_v46  ;;  %v1140_v37 = vperm.slane %v2541_v12, %v1139_v33  ;;  %vm1141_vm0 = vcmask 982912  }
 0x282   : > { %v1122_v19 = vsel %vm1121_vm11, %v1120_v57, %v1118_v50  ;;  %v1148_v8 = vperm.slane %v2566_v23, %v2891_v6  ;;  %v1144_v30 = vperm.slane %v2561_v55, %v1143_v43  ;;  %v1149_v17 = vperm.slane %v2568_v0, %v2621_v14 }
 0x283   : > { %v1126_v3 = vsel %vm1125_vm12, %v1124_v2, %v1122_v19  ;;  %v1151_v22 = vperm.slane %v2583_v20, %v2624_v42  ;;  %vm1145_vm1 = vcmask 1048512   ;;  %v1153_v60 = vperm.slane %v2594_v36, %v2627_v58 }
 0x284   : > { %v1130_v24 = vsel %vm1129_vm13, %v1128_v1, %v1126_v3  ;;  %v1155_v6 = vperm.slane %v2592_v56, %v2630_v11  ;;  %v1150_v5 = vsel %vm1089_vm3, %v1149_v17, %v1148_v8  ;;  %v1157_v1 = vperm.slane %v2603_v47, %v2637_v45 }
 0x285   : > { %v1134_v57 = vsel %vm1133_vm14, %v1132_v4, %v1130_v24  ;;  %v1152_v42 = vsel %vm1093_vm4, %v1151_v22, %v1150_v5  ;;  %v1159_v50 = vperm.slane %v2526_v59, %v2644_v7  ;;  %v1161_v11 = vperm.slane %v2543_v54, %v2650_v34 }
 0x286   : > { %v1138_v2 = vsel %vm1137_vm15, %v1136_v52, %v1134_v57  ;;  %v1154_v58 = vsel %vm1097_vm5, %v1153_v60, %v1152_v42  ;;  %v1163_v52 = vperm.slane %v2548_v18, %v1115_v62  ;;  %v1165_v3 = vperm.slane %v2550_v15, %v1119_v63 }
 0x287   : > { %v1142_v14 = vsel %vm1141_vm0, %v1140_v37, %v1138_v2  ;;  %v1156_v19 = vsel %vm1101_vm6, %v1155_v6, %v1154_v58  ;;  %v1167_v7 = vperm.slane %v2570_v35, %v1123_v38  ;;  %v1169_v24 = vperm.slane %v2575_v28, %v1127_v31 }
 0x288   : > { %v1146_v4 = vsel %vm1145_vm1, %v1144_v30, %v1142_v14  ;;  %v1158_v45 = vsel %vm1105_vm7, %v1157_v1, %v1156_v19  ;;  %v1171_v30 = vperm.slane %v2579_v9, %v1131_v27  ;;  %v1173_v62 = vperm.slane %v2608_v61, %v1135_v46 }
 0x289   : > { %1147 = vst [vmem:[%s1826_s27] ss:$2 sm:$0x1] %v1146_v4  ;;  %v1160_v37 = vsel %vm1109_vm8, %v1159_v50, %v1158_v45  ;;  %v1175_v63 = vperm.slane %v2615_v39, %v1139_v33  ;;  %v1177_v38 = vperm.slane %v2610_v10, %v1143_v43 }
 0x28a   : > { %v1162_v8 = vsel %vm1113_vm9, %v1161_v11, %v1160_v37 }
 0x28b   : > { %v1164_v34 = vsel %vm1117_vm10, %v1163_v52, %v1162_v8 }
 0x28c   : > { %v1166_v17 = vsel %vm1121_vm11, %v1165_v3, %v1164_v34 }
 0x28d   : > { %v1168_v22 = vsel %vm1125_vm12, %v1167_v7, %v1166_v17 }
 0x28e   : > { %v1170_v57 = vsel %vm1129_vm13, %v1169_v24, %v1168_v22 }
 0x28f   : > { %v1172_v60 = vsel %vm1133_vm14, %v1171_v30, %v1170_v57 }
 0x290   : > { %v1174_v31 = vsel %vm1137_vm15, %v1173_v62, %v1172_v60 }
 0x291   : > { %v1176_v6 = vsel %vm1141_vm0, %v1175_v63, %v1174_v31 }
 0x292   : > { %v1178_v27 = vsel %vm1145_vm1, %v1177_v38, %v1176_v6 }
 0x293   : > { %1574 = vst [vmem:[%s1826_s27 + $0x1] ss:$2 sm:$0x1] %v1178_v27 }
 0x294 PF: > { %v2892_v2 = vld [vmem:[#allocation11_spill] sm:$0xff]  ;;  %v2893_v46 = vld [vmem:[#allocation8_spill] sm:$0xff]  ;;  %v2894_v5 = vld [vmem:[#allocation5_spill] sm:$0xff]  ;;  %v1764_v3 = vmov 1.0|1.0  }
 0x295   : > { %1326 = vxpose.xlu0.c.b16.start [1/8] (narrow) %v2892_v2, 16  ;;  %1664 = vmatpush.lsf.bf16.msrb.mxu1 %v2893_v46  ;;  %v2895_v33 = vld [vmem:[#allocation19_spill] sm:$0xff]  ;;  %v2896_v1 = vld [vmem:[#allocation16_spill] sm:$0xff]  ;;  %v2897_v43 = vld [vmem:[#allocation14_spill] sm:$0xff] }
 0x296   : > { %v2898_v14 = vld [vmem:[#allocation13_spill] sm:$0xff]  ;;  %v2899_v42 = vld [vmem:[#allocation10_spill] sm:$0xff]  ;;  %v2900_v50 = vld [vmem:[#allocation7_spill] sm:$0xff] }
 0x297   : > { %v2901_v4 = vld [vmem:[#allocation4_spill] sm:$0xff]  ;;  %v2902_v58 = vld [vmem:[#allocation17_spill] sm:$0xff]  ;;  %v2903_v11 = vld [vmem:[#allocation6_spill] sm:$0xff] }
 0x298   : > { %v2904_v19 = vld [vmem:[#allocation9_spill] sm:$0xff]  ;;  %v2905_v52 = vld [vmem:[#allocation12_spill] sm:$0xff] }
 0x299   : > { %1665 = vmatpush.lsf.bf16.msrb.mxu1 %v2894_v5  ;;  %v2906_v45 = vld [vmem:[#allocation20_spill] sm:$0xff] }
 0x29a   : > { %vm1211_vm2 = vcmp.eq.s32.totalorder %v2615_v39, %v2906_v45  ;;  %vm1212_vm3 = vcmp.eq.s32.totalorder %v2610_v10, %v2906_v45  ;;  %vm1209_vm4 = vcmp.eq.s32.totalorder %v2579_v9, %v2906_v45  ;;  %vm1210_vm6 = vcmp.eq.s32.totalorder %v2608_v61, %v2906_v45 }
 0x29b   : > { %vm1623_vm5 = vmpackc.low %vm1212_vm3, %vm1211_vm2  ;;  %vm1195_vm7 = vcmp.eq.s32.totalorder %v2541_v12, %v2906_v45  ;;  %vm1196_vm8 = vcmp.eq.s32.totalorder %v2561_v55, %v2906_v45  ;;  %vm1193_vm10 = vcmp.eq.s32.totalorder %v2528_v32, %v2906_v45  ;;  %vm1194_vm11 = vcmp.eq.s32.totalorder %v2537_v51, %v2906_v45  ;;  %v2907_v32 = vld [vmem:[#allocation15_spill] sm:$0xff] }
 0x29c   : > { %1624 = vmatpush.bf16.msk.msra.mxu2 %vm1623_vm5, %v1764_v3  ;;  %vm1625_vm9 = vmpackc.low %vm1210_vm6, %vm1209_vm4  ;;  %vm1207_vm13 = vcmp.eq.s32.totalorder %v2570_v35, %v2906_v45  ;;  %vm1208_vm14 = vcmp.eq.s32.totalorder %v2575_v28, %v2906_v45  ;;  %vm1191_vm0 = vcmp.eq.s32.totalorder %v2601_v53, %v2906_v45  ;;  %vm1192_vm1 = vcmp.eq.s32.totalorder %v2612_v25, %v2906_v45 }
 0x29d   : > { %1666 = vmatpush.lsf.bf16.msrb.mxu1 %v2895_v33  ;;  %vm1607_vm12 = vmpackc.low %vm1196_vm8, %vm1195_vm7  ;;  %vm1205_vm3 = vcmp.eq.s32.totalorder %v2548_v18, %v2906_v45  ;;  %vm1206_vm4 = vcmp.eq.s32.totalorder %v2550_v15, %v2906_v45  ;;  %vm1189_vm6 = vcmp.eq.s32.totalorder %v2590_v49, %v2906_v45  ;;  %vm1190_vm7 = vcmp.eq.s32.totalorder %v2599_v29, %v2906_v45  ;;  %v1392_v29 = vld [vmem:[#allocation3] sm:$0xff] }
 0x29e   : > { %vm1609_vm15 = vmpackc.low %vm1194_vm11, %vm1193_vm10  ;;  %vm1204_vm10 = vcmp.eq.s32.totalorder %v2543_v54, %v2906_v45 }
 0x29f   : > { %vm1627_vm2 = vmpackc.low %vm1208_vm14, %vm1207_vm13  ;;  %vm1188_vm13 = vcmp.eq.s32.totalorder %v2585_v40, %v2906_v45 }
 0x2a0   : > { %1626 = vmatpush.bf16.msk.msra.mxu2 %vm1625_vm9, %v1764_v3  ;;  %vm1611_vm5 = vmpackc.low %vm1192_vm1, %vm1191_vm0  ;;  %vm1203_vm9 = vcmp.eq.s32.totalorder %v2526_v59, %v2906_v45  ;;  %vm1202_vm0 = vcmp.eq.s32.totalorder %v2603_v47, %v2906_v45  ;;  %v2908_v59 = vld [vmem:[#allocation18_spill] sm:$0xff] }
 0x2a1   : > { %1667 = vmatpush.lsf.bf16.msrb.mxu1 %v2896_v1  ;;  %vm1629_vm8 = vmpackc.low %vm1206_vm4, %vm1205_vm3  ;;  %vm1186_vm3 = vcmp.eq.s32.totalorder %v2559_v26, %v2906_v45 }
 0x2a2   : > { %vm1613_vm11 = vmpackc.low %vm1190_vm7, %vm1189_vm6  ;;  %vm1200_vm6 = vcmp.eq.s32.totalorder %v2594_v36, %v2906_v45 }
 0x2a3   : > { %vm1631_vm14 = vmpackc.low %vm1204_vm10, %vm1203_vm9  ;;  %vm1197_vm9 = vcmp.eq.s32.totalorder %v2566_v23, %v2906_v45  ;;  %vm1198_vm10 = vcmp.eq.s32.totalorder %v2568_v0, %v2906_v45 }
 0x2a4   : > { %1628 = vmatpush.bf16.msk.msra.mxu2 %vm1627_vm2, %v1764_v3  ;;  %vm1185_vm2 = vcmp.eq.s32.totalorder %v2557_v13, %v2906_v45 }
 0x2a5   : > { %1327 = vxpose.xlu0.c.b16.cont [2/8] (narrow) %v2897_v43, 16  ;;  %1668 = vmatpush.lsf.bf16.msrb.mxu1 %v2898_v14  ;;  %vm1617_vm7 = vmpackc.low %vm1186_vm3, %vm1185_vm2 }
 0x2a8   : > { %1630 = vmatpush.bf16.msk.msra.mxu2 %vm1629_vm8, %v1764_v3 }
 0x2a9   : > { %1669 = vmatpush.lsf.bf16.msrb.mxu1 %v2899_v42 }
 0x2ac   : > { %1632 = vmatpush.bf16.msk.msra.mxu2 %vm1631_vm14, %v1764_v3 }
 0x2ad   : > { %1670 = vmatpush.lsf.bf16.msrb.mxu1 %v2900_v50 }
 0x2b1   : > { %1671 = vmatpush.lsf.bf16.msrb.mxu1 %v2901_v4 }
 0x2b3   : > { %1672 = vllmr.2.mxu1 }
 0x2b5   : > { %1328 = vxpose.xlu0.c.b16.cont [3/8] (narrow) %v2902_v58, 16  ;;  %1608 = vmatpush.bf16.msk.msra.mxu1 %vm1607_vm12, %v1764_v3  ;;  %vm1187_vm12 = vcmp.eq.s32.totalorder %v2577_v44, %v2906_v45  ;;  %v1765_v44 = vmov 0  }
 0x2b6   : > { %vm1615_vm1 = vmpackc.low %vm1188_vm13, %vm1187_vm12  ;;  %vm1183_vm12 = vcmp.eq.s32.totalorder %v2535_v41, %v2906_v45  ;;  %vm1184_vm13 = vcmp.eq.s32.totalorder %v2552_v48, %v2906_v45  ;;  %v1293_v41 = vld [vmem:[#allocation2] sm:$0xff] }
 0x2b7   : > { %vm1619_vm14 = vmpackc.low %vm1184_vm13, %vm1183_vm12 }
 0x2b9   : > { %1610 = vmatpush.bf16.msk.msra.mxu1 %vm1609_vm15, %v1764_v3  ;;  %vm1201_vm15 = vcmp.eq.s32.totalorder %v2592_v56, %v2906_v45 }
 0x2ba   : > { %vm1633_vm4 = vmpackc.low %vm1202_vm0, %vm1201_vm15  ;;  %vm1181_vm15 = vcmp.eq.s32.totalorder %v2522_v21, %v2906_v45  ;;  %vm1182_vm0 = vcmp.eq.s32.totalorder %v2531_v16, %v2906_v45 }
 0x2bb   : > { %1634 = vmatpush.bf16.msk.msra.mxu2 %vm1633_vm4, %v1764_v3 }
 0x2bd   : > { %1612 = vmatpush.bf16.msk.msra.mxu1 %vm1611_vm5, %v1764_v3  ;;  %vm1199_vm5 = vcmp.eq.s32.totalorder %v2583_v20, %v2906_v45 }
 0x2be   : > { %vm1635_vm8 = vmpackc.low %vm1200_vm6, %vm1199_vm5 }
 0x2bf   : > { %1636 = vmatpush.bf16.msk.msra.mxu2 %vm1635_vm8, %v1764_v3 }
 0x2c1   : > { %1614 = vmatpush.bf16.msk.msra.mxu1 %vm1613_vm11, %v1764_v3  ;;  %vm1637_vm11 = vmpackc.low %vm1198_vm10, %vm1197_vm9 }
 0x2c3   : > { %1638 = vmatpush.bf16.msk.msra.mxu2 %vm1637_vm11, %v1764_v3 }
 0x2c5   : > { %1329 = vxpose.xlu0.c.b16.cont [4/8] (narrow) %v2903_v11, 16  ;;  %1616 = vmatpush.bf16.msk.msra.mxu1 %vm1615_vm1, %v1764_v3  ;;  %vm1621_vm1 = vmpackc.low %vm1182_vm0, %vm1181_vm15 }
 0x2c9   : > { %1618 = vmatpush.bf16.msk.msra.mxu1 %vm1617_vm7, %v1764_v3 }
 0x2cd   : > { %1620 = vmatpush.bf16.msk.msra.mxu1 %vm1619_vm14, %v1764_v3 }
 0x2d1   : > { %1622 = vmatpush.bf16.msk.msra.mxu1 %vm1621_vm1, %v1764_v3 }
 0x2d4   : > { %1673 = vmatmul.lmr.bf16.vlgmr.msra.gmra.2.mxu1 }
 0x2d5   : > { %1330 = vxpose.xlu0.c.b16.cont [5/8] (narrow) %v2904_v19, 16 }
 0x2dc   : > { %1674 = vmatmul.lmr.bf16.gmra.2.mxu1 }
 0x2e5   : > { %1331 = vxpose.xlu0.c.b16.cont [6/8] (narrow) %v2905_v52, 16 }
 0x2f5   : > { %1332 = vxpose.xlu0.c.b16.cont [7/8] (narrow) %v2907_v32, 16 }
 0x305   : > { %1333 = vxpose.xlu0.c.b16.end [8/8] (narrow) %v2908_v59, 16 }
 0x341   : > { %v1334_v51 = vpop.trf.xlu0 }
 0x342   : > { %1363 = vmatmul.bf16.vlgmr.msra.gmra.mxu2 %v1334_v51 }
 0x351   : > { %v1351_v12 = vpop.f32.mrf.mxu1 }
 0x359   : > { %v1353_v54 = vpop.f32.mrf.mxu1 }
 0x3c5   : > { %v1364_v18 = vpop.f32.mrf.mxu2 }
 0x3c6   : > { %v1365_v15 = vadd.f32 %v1364_v18, %v1351_v12 }
 0x3c8   : > { %v1368_v48 = vadd.f32 %v1365_v15, %v1293_v41 }
 0x3ca   : > { %1369 = vst [vmem:[#allocation2] sm:$0xff] %v1368_v48  ;;  %v1375_v13 = vmax.f32 %v1368_v48, 1.0  ;;  %vm1374_vm2 = vcmp.gt.f32.partialorder %v1368_v48, 0.5 }
 0x3cb   : > { %v1393_v9 = vsel %vm1374_vm2, 1, %v1765_v44 }
 0x3cc   : > { %v1376_v26 = vperm.slane %v1375_v13, 5  ;;  %v1394_v49 = vperm.slane %v1393_v9, 5 }
 0x3cd   : > { %v1366_v55 = vpop.f32.mrf.mxu2 }
 0x3ce   : > { %1721 = vrcp.f32 %v1376_v26  ;;  %v1388_v0 = vand.u32 2147483648, %v1376_v26  ;;  %v1386_v28 = vand.u32 2147483647, %v1376_v26  ;;  %vm1382_vm4 = vweird.f32 %v1376_v26 }
 0x3cf   : > { %vm1395_vm7 = vcmp.eq.s32.totalorder %v1394_v49, 1 }
 0x3d0   : > { %v1389_v40 = vor.u32 1.1754944e-38, %v1388_v0  ;;  %vm1387_vm6 = vcmp.eq.f32.partialorder %v1386_v28, 8.507059e+37 }
 0x3d4   : > { %v1722_v21 = vpop.eup %1721 }
 0x3d5   : > { %v1378_v23 = vmul.f32 %v1722_v21, %v1376_v26  ;;  %vm1383_vm3 = vweird.f32 %v1722_v21 }
 0x3d6   : > { %vm1384_vm5 = vmor %vm1382_vm4, %vm1383_vm3 }
 0x3d7   : > { %v1379_v16 = vsub.f32 1.0, %v1378_v23 }
 0x3d9   : > { %v1380_v35 = vmul.f32 %v1722_v21, %v1379_v16 }
 0x3db   : > { %v1381_v20 = vadd.f32 %v1722_v21, %v1380_v35 }
 0x3dd   : > { %v1385_v56 = vsel %vm1384_vm5, %v1722_v21, %v1381_v20 }
 0x3de   : > { %v1390_v36 = vsel %vm1387_vm6, %v1389_v40, %v1385_v56 }
 0x3df   : > { %v1391_v53 = vmul.f32 %v1390_v36, %v1368_v48 }
 0x3e1   : > { %v1396_v47 = vsel %vm1395_vm7, %v1391_v53, %v1392_v29 }
 0x3e2   : > { %1397 = vst [vmem:[#allocation3] sm:$0xff] %v1396_v47 }
 0x3e3 PF: > { %s12_s13 = sadd.s32 1, %s1761_s13   ;;  %s2909_s9 = smov %s1753_s11 }
 0x3e4   : > { %p9_p8 = scmp.ge.s32.totalorder %s12_s13, 12   ;;  %s2910_s10 = smov %s1757_s12 }
 0x3e5   : > { %s2911_s11 = smov %s2914_s14  ;;  %s2912_s12 = smov %s2918_s15 }
 0x3e6   :  { %11 = sbr.rel (!%p9_p8) target bundleno = 3 (0x3), region = 78 }

</bundles_post_ra>
